<compile_context>
chip_gen: v7x
topology: tpu7x:2x2x1
jax: 0.10.0
libtpu: 0.0.40
codegen_flags: <defaults>
</compile_context>

<pallas_src>
import jax
import jax.numpy as jnp
from jax import lax
from jax.experimental import pallas as pl
from jax.experimental.pallas import tpu as pltpu


_STATIC_UNROLL_MAX_T = 32  # fully unroll the time loop up to this length


def _lstm_cell(gates, c, H):
    """LSTM cell with gate layout (i, f, o, g): one wide sigmoid + one tanh."""
    sig = jax.nn.sigmoid(gates[:, : 3 * H])          # contiguous (1, 3H)
    i = sig[:, 0 * H:1 * H]
    f = sig[:, 1 * H:2 * H]
    o = sig[:, 2 * H:3 * H]
    g = jnp.tanh(gates[:, 3 * H:])
    c_new = f * c + i * g
    h_new = o * jnp.tanh(c_new)
    return h_new, c_new


def encoder_kernel(x_ref, wih1_ref, b1_ref, wf_ref, b2_ref, out_ref, gx1_ref):
    """Fused 2-layer LSTM encoder for one sequence (one grid step).

    x_ref   : (1, T, Fin)        VMEM block (one sequence)
    wih1_ref: (Fin, 4H1)         b1_ref: (1, 4H1)
    wf_ref  : (H1+H2, 4H1+4H2)   skewed fused recurrent weights
    b2_ref  : (1, 4H2)
    out_ref : (1, 1, H2)         final layer-2 hidden state
    gx1_ref : (T, 4H1)           VMEM scratch for the hoisted input projection
    All weight/bias gate columns are pre-permuted to (i, f, o, g).
    """
    T = x_ref.shape[1]
    Fin = x_ref.shape[2]
    H1 = wih1_ref.shape[1] // 4
    H2 = b2_ref.shape[1] // 4
    G1 = 4 * H1

    # Hoisted layer-1 input projection for all timesteps (off the serial path).
    x2d = x_ref[0]                                          # (T, Fin)
    if Fin == 1:
        # K=1 outer product: pure VPU broadcast, no wasted MXU push.
        gx1 = x2d * wih1_ref[...] + b1_ref[...]             # (T, 4H1)
    else:
        gx1 = jnp.dot(x2d, wih1_ref[...],
                      preferred_element_type=jnp.float32) + b1_ref[...]
    gx1_ref[...] = gx1   # park in VMEM scratch -> no long vreg live ranges

    rec1 = jnp.zeros((1, G1), jnp.float32)   # h1(t-1) @ whh1, zero for t == 0
    c1 = jnp.zeros((1, H1), jnp.float32)
    h2 = jnp.zeros((1, H2), jnp.float32)
    c2 = jnp.zeros((1, H2), jnp.float32)

    def step(t, carry):
        rec1, c1, h2, c2 = carry
        # Layer 1: recurrent gates for this step were produced by the previous
        # step's fused matmul (rec1); only the cell math remains here.
        gates1 = gx1_ref[pl.ds(t, 1), :] + rec1
        h1, c1 = _lstm_cell(gates1, c1, H1)
        # ONE fused MXU matmul: [h1(t) | h2(t-1)] @ [[whh1|wih2],[0|whh2]]
        #   -> [ layer-1 recurrent gates for t+1 | layer-2 gates for t ].
        lhs = jnp.concatenate([h1, h2], axis=1)              # (1, H1+H2)
        fused = jnp.dot(lhs, wf_ref[...],
                        preferred_element_type=jnp.float32)  # (1, 4H1+4H2)
        rec1 = fused[:, :G1]
        gates2 = fused[:, G1:] + b2_ref[...]
        h2, c2 = _lstm_cell(gates2, c2, H2)
        return rec1, c1, h2, c2

    carry = (rec1, c1, h2, c2)
    if T <= _STATIC_UNROLL_MAX_T:
        # Fully unrolled: T is a compile-time constant, all slices static.
        for t in range(T):
            carry = step(t, carry)
    else:
        carry = lax.fori_loop(0, T, step, carry, unroll=8)

    _, _, h2, _ = carry
    out_ref[...] = h2.reshape(1, 1, H2)


def _permute_gates(w):
    """PyTorch gate order (i, f, g, o) -> kernel order (i, f, o, g) along axis 0."""
    H = w.shape[0] // 4
    return jnp.concatenate([w[:2 * H], w[3 * H:], w[2 * H:3 * H]], axis=0)


class EncoderParams:
    """Deterministic parameter container matching the PyTorch module shapes.

    Keeps PyTorch-layout weights for the reference, and precomputes kernel-ready
    layouts (transposed, gate-permuted, biases pre-summed, skew-fused) once.
    """

    def __init__(self, seq_len, n_features, embedding_dim=64, key=None):
        self.seq_len = seq_len
        self.n_features = n_features
        self.embedding_dim = embedding_dim
        self.hidden_dim = 2 * embedding_dim
        if key is None:
            key = jax.random.PRNGKey(0)
        ks = jax.random.split(key, 8)

        def u(k, shape, fan):
            bound = 1.0 / jnp.sqrt(jnp.float32(fan))
            return jax.random.uniform(k, shape, jnp.float32, -bound, bound)

        H1, H2 = self.hidden_dim, self.embedding_dim
        # PyTorch layout (gate order i, f, g, o) -- used by the pure-JAX reference.
        self.w_ih1 = u(ks[0], (4 * H1, n_features), H1)
        self.w_hh1 = u(ks[1], (4 * H1, H1), H1)
        self.b_ih1 = u(ks[2], (4 * H1,), H1)
        self.b_hh1 = u(ks[3], (4 * H1,), H1)
        self.w_ih2 = u(ks[4], (4 * H2, H1), H2)
        self.w_hh2 = u(ks[5], (4 * H2, H2), H2)
        self.b_ih2 = u(ks[6], (4 * H2,), H2)
        self.b_hh2 = u(ks[7], (4 * H2,), H2)

        # Kernel-ready layouts (computed once, not per forward call).
        self.wih1_t = _permute_gates(self.w_ih1).T                      # (Fin, 4H1)
        whh1_t = _permute_gates(self.w_hh1).T                           # (H1, 4H1)
        self.bias1 = _permute_gates(self.b_ih1 + self.b_hh1).reshape(1, 4 * H1)
        wih2_t = _permute_gates(self.w_ih2).T                           # (H1, 4H2)
        whh2_t = _permute_gates(self.w_hh2).T                           # (H2, 4H2)
        self.bias2 = _permute_gates(self.b_ih2 + self.b_hh2).reshape(1, 4 * H2)

        # Skewed fusion block: [[whh1 | wih2], [0 | whh2]] -> (H1+H2, 4H1+4H2).
        top = jnp.concatenate([whh1_t, wih2_t], axis=1)
        bot = jnp.concatenate([jnp.zeros((H2, 4 * H1), jnp.float32), whh2_t],
                              axis=1)
        self.w_fused = jnp.concatenate([top, bot], axis=0)


def encode_batch_final_hidden(params: EncoderParams, xs):
    """xs: (B, T, n_features) -> (B, embedding_dim) final layer-2 hidden states.

    Grid over the batch axis; weight BlockSpecs use constant index maps so the
    ~tens-of-KB of weights stay VMEM-resident across grid steps, and the batch
    axis is 'parallel' (both v7x TensorCores usable).
    """
    B, T, Fin = xs.shape
    H1, H2 = params.hidden_dim, params.embedding_dim
    out = pl.pallas_call(
        encoder_kernel,
        out_shape=jax.ShapeDtypeStruct((B, 1, H2), jnp.float32),
        grid_spec=pltpu.PrefetchScalarGridSpec(
            num_scalar_prefetch=0,
            grid=(B,),
            in_specs=[
                pl.BlockSpec((1, T, Fin), lambda b: (b, 0, 0)),
                pl.BlockSpec((Fin, 4 * H1), lambda b: (0, 0)),
                pl.BlockSpec((1, 4 * H1), lambda b: (0, 0)),
                pl.BlockSpec((H1 + H2, 4 * (H1 + H2)), lambda b: (0, 0)),
                pl.BlockSpec((1, 4 * H2), lambda b: (0, 0)),
            ],
            out_specs=pl.BlockSpec((1, 1, H2), lambda b: (b, 0, 0)),
            scratch_shapes=[pltpu.VMEM((T, 4 * H1), jnp.float32)],
        ),
        compiler_params=pltpu.CompilerParams(
            dimension_semantics=("parallel",)),
    )(xs.astype(jnp.float32), params.wih1_t, params.bias1,
      params.w_fused, params.bias2)
    return out.reshape(B, H2)


def encoder_forward(params: EncoderParams, x):
    """Mirrors Encoder.forward: x -> (n_features, embedding_dim)."""
    T, F, E = params.seq_len, params.n_features, params.embedding_dim
    xs = jnp.reshape(x, (1, T, F)).astype(jnp.float32)     # batch = 1, time-major
    h_n = encode_batch_final_hidden(params, xs)            # (1, E)
    # NOTE: like the original PyTorch forward, this reshape is only valid for
    # n_features == 1 (hidden_n has 1*1*embedding_dim elements).
    return jnp.reshape(h_n, (F, E))


# --- pure-JAX reference (PyTorch layout / gate order) for correctness -------
def _ref_lstm_layer(x, w_ih, w_hh, b_ih, b_hh):
    H = w_hh.shape[1]

    def step(carry, x_t):
        h, c = carry
        gates = x_t @ w_ih.T + h @ w_hh.T + b_ih + b_hh
        i = jax.nn.sigmoid(gates[0 * H:1 * H])
        f = jax.nn.sigmoid(gates[1 * H:2 * H])
        g = jnp.tanh(gates[2 * H:3 * H])
        o = jax.nn.sigmoid(gates[3 * H:4 * H])
        c_new = f * c + i * g
        h_new = o * jnp.tanh(c_new)
        return (h_new, c_new), h_new

    h0 = jnp.zeros((H,), jnp.float32)
    (_, _), hs = lax.scan(step, (h0, h0), x)
    return hs


def _ref_encoder(params, x):
    x2d = jnp.reshape(x, (params.seq_len, params.n_features)).astype(jnp.float32)
    h1 = _ref_lstm_layer(x2d, params.w_ih1, params.w_hh1, params.b_ih1, params.b_hh1)
    h2 = _ref_lstm_layer(h1, params.w_ih2, params.w_hh2, params.b_ih2, params.b_hh2)
    return jnp.reshape(h2[-1], (params.n_features, params.embedding_dim))


if __name__ == "__main__":
    # The original forward's hidden_n.reshape((n_features, embedding_dim)) is
    # only valid when n_features == 1.
    seq_len, n_features, embedding_dim = 8, 1, 32

    key = jax.random.PRNGKey(0)
    pkey, xkey = jax.random.split(key)
    params = EncoderParams(seq_len, n_features, embedding_dim, key=pkey)
    x = jax.random.normal(xkey, (seq_len, n_features), jnp.float32)

    out = jax.block_until_ready(encoder_forward(params, x))
    assert out.shape == (n_features, embedding_dim)

    ref = jax.block_until_ready(_ref_encoder(params, x))
    assert jnp.allclose(out, ref, atol=2e-4, rtol=2e-4), "mismatch vs JAX reference"

    # Batched path: grid over sequences, weights VMEM-resident across grid steps.
    xb = jax.random.normal(jax.random.PRNGKey(1), (2, seq_len, n_features),
                           jnp.float32)
    outs = jax.block_until_ready(encode_batch_final_hidden(params, xb))
    refs = jnp.stack([_ref_encoder(params, xb[i]).reshape(-1) for i in range(2)])
    assert jnp.allclose(outs, refs, atol=2e-4, rtol=2e-4), "batched mismatch"

    print("KERNEL_OK")
</pallas_src>

<mosaic_0001>
module attributes {stable_mosaic.version = 11 : i64} {
  func.func @encoder_kernel(%arg0: i32, %arg1: memref<1x8x1xf32, #tpu.memory_space<vmem>>, %arg2: memref<1x256xf32, #tpu.memory_space<vmem>>, %arg3: memref<1x256xf32, #tpu.memory_space<vmem>>, %arg4: memref<96x384xf32, #tpu.memory_space<vmem>>, %arg5: memref<1x128xf32, #tpu.memory_space<vmem>>, %arg6: memref<1x1x32xf32, #tpu.memory_space<vmem>>, %arg7: memref<8x256xf32, #tpu.memory_space<vmem>>) attributes {dimension_semantics = [#tpu.dimension_semantics<parallel>], iteration_bounds = array<i64: 1>, scalar_prefetch = 0 : i64, scratch_operands = 1 : i64, tpu.core_type = #tpu.core_type<tc>, window_params = [{transform_indices = @transform_0, window_bounds = array<i64: 1, 8, 1>}, {pipeline_mode = #tpu.pipeline_mode<synchronous>, transform_indices = @transform_1, window_bounds = array<i64: 1, 256>}, {pipeline_mode = #tpu.pipeline_mode<synchronous>, transform_indices = @transform_2, window_bounds = array<i64: 1, 256>}, {pipeline_mode = #tpu.pipeline_mode<synchronous>, transform_indices = @transform_3, window_bounds = array<i64: 96, 384>}, {pipeline_mode = #tpu.pipeline_mode<synchronous>, transform_indices = @transform_4, window_bounds = array<i64: 1, 128>}, {transform_indices = @transform_5, window_bounds = array<i64: 1, 1, 32>}]} {
    %c0 = arith.constant 0 : index
    %c0_0 = arith.constant 0 : index
    %c0_1 = arith.constant 0 : index
    %0 = vector.load %arg1[%c0, %c0_0, %c0_1] : memref<1x8x1xf32, #tpu.memory_space<vmem>>, vector<1x8x1xf32>
    %1 = vector.shape_cast %0 : vector<1x8x1xf32> to vector<8x1xf32>
    %c0_2 = arith.constant 0 : index
    %c0_3 = arith.constant 0 : index
    %2 = vector.load %arg2[%c0_2, %c0_3] : memref<1x256xf32, #tpu.memory_space<vmem>>, vector<1x256xf32>
    %3 = vector.broadcast %1 : vector<8x1xf32> to vector<8x256xf32>
    %4 = vector.broadcast %2 : vector<1x256xf32> to vector<8x256xf32>
    %5 = arith.mulf %3, %4 : vector<8x256xf32>
    %c0_4 = arith.constant 0 : index
    %c0_5 = arith.constant 0 : index
    %6 = vector.load %arg3[%c0_4, %c0_5] : memref<1x256xf32, #tpu.memory_space<vmem>>, vector<1x256xf32>
    %7 = vector.broadcast %6 : vector<1x256xf32> to vector<8x256xf32>
    %8 = arith.addf %5, %7 : vector<8x256xf32>
    %c0_6 = arith.constant 0 : index
    %c0_7 = arith.constant 0 : index
    %9 = vector.load %arg7[%c0_6, %c0_7] : memref<8x256xf32, #tpu.memory_space<vmem>>, vector<8x256xf32>
    tpu.vector_store %arg7[%c0_6, %c0_7], %8 {strides = array<i32>} : memref<8x256xf32, #tpu.memory_space<vmem>>, vector<8x256xf32>,
    %cst = arith.constant 0.000000e+00 : f32
    %10 = vector.broadcast %cst : f32 to vector<1x256xf32>
    %cst_8 = arith.constant 0.000000e+00 : f32
    %11 = vector.broadcast %cst_8 : f32 to vector<1x64xf32>
    %cst_9 = arith.constant 0.000000e+00 : f32
    %12 = vector.broadcast %cst_9 : f32 to vector<1x32xf32>
    %cst_10 = arith.constant 0.000000e+00 : f32
    %13 = vector.broadcast %cst_10 : f32 to vector<1x32xf32>
    %c0_11 = arith.constant 0 : index
    %c0_12 = arith.constant 0 : index
    %14 = vector.load %arg7[%c0_11, %c0_12] : memref<8x256xf32, #tpu.memory_space<vmem>>, vector<1x256xf32>
    %15 = arith.addf %14, %10 : vector<1x256xf32>
    %16 = vector.extract_strided_slice %15 {offsets = [0, 0], sizes = [1, 192], strides = [1, 1]} : vector<1x256xf32> to vector<1x192xf32>
    %17 = arith.negf %16 : vector<1x192xf32>
    %18 = math.exp %17 : vector<1x192xf32>
    %cst_13 = arith.constant 1.000000e+00 : f32
    %19 = vector.broadcast %cst_13 : f32 to vector<1x192xf32>
    %20 = arith.addf %19, %18 : vector<1x192xf32>
    %21 = arith.divf %19, %20 : vector<1x192xf32>
    %22 = vector.extract_strided_slice %21 {offsets = [0, 0], sizes = [1, 64], strides = [1, 1]} : vector<1x192xf32> to vector<1x64xf32>
    %23 = vector.extract_strided_slice %21 {offsets = [0, 64], sizes = [1, 64], strides = [1, 1]} : vector<1x192xf32> to vector<1x64xf32>
    %24 = vector.extract_strided_slice %21 {offsets = [0, 128], sizes = [1, 64], strides = [1, 1]} : vector<1x192xf32> to vector<1x64xf32>
    %25 = vector.extract_strided_slice %15 {offsets = [0, 192], sizes = [1, 64], strides = [1, 1]} : vector<1x256xf32> to vector<1x64xf32>
    %26 = math.tanh %25 : vector<1x64xf32>
    %27 = arith.mulf %23, %11 : vector<1x64xf32>
    %28 = arith.mulf %22, %26 : vector<1x64xf32>
    %29 = arith.addf %27, %28 : vector<1x64xf32>
    %30 = math.tanh %29 : vector<1x64xf32>
    %31 = arith.mulf %24, %30 : vector<1x64xf32>
    %32 = tpu.concatenate %31, %12 in 1 : vector<1x64xf32>, vector<1x32xf32> -> vector<1x96xf32>
    %c0_14 = arith.constant 0 : index
    %c0_15 = arith.constant 0 : index
    %33 = vector.load %arg4[%c0_14, %c0_15] : memref<96x384xf32, #tpu.memory_space<vmem>>, vector<96x384xf32>
    %cst_16 = arith.constant dense<0.000000e+00> : vector<1x384xf32>
    %34 = tpu.matmul %32, %33, %cst_16 {dimension_numbers = #tpu.dot_dimension_numbers<[1], [0], [0], [1], [0, 0, 1, 1], [], []>} : vector<1x96xf32>, vector<96x384xf32>, vector<1x384xf32> -> vector<1x384xf32>
    %35 = vector.extract_strided_slice %34 {offsets = [0, 0], sizes = [1, 256], strides = [1, 1]} : vector<1x384xf32> to vector<1x256xf32>
    %36 = vector.extract_strided_slice %34 {offsets = [0, 256], sizes = [1, 128], strides = [1, 1]} : vector<1x384xf32> to vector<1x128xf32>
    %c0_17 = arith.constant 0 : index
    %c0_18 = arith.constant 0 : index
    %37 = vector.load %arg5[%c0_17, %c0_18] : memref<1x128xf32, #tpu.memory_space<vmem>>, vector<1x128xf32>
    %38 = arith.addf %36, %37 : vector<1x128xf32>
    %39 = vector.extract_strided_slice %38 {offsets = [0, 0], sizes = [1, 96], strides = [1, 1]} : vector<1x128xf32> to vector<1x96xf32>
    %40 = arith.negf %39 : vector<1x96xf32>
    %41 = math.exp %40 : vector<1x96xf32>
    %cst_19 = arith.constant 1.000000e+00 : f32
    %42 = vector.broadcast %cst_19 : f32 to vector<1x96xf32>
    %43 = arith.addf %42, %41 : vector<1x96xf32>
    %44 = arith.divf %42, %43 : vector<1x96xf32>
    %45 = vector.extract_strided_slice %44 {offsets = [0, 0], sizes = [1, 32], strides = [1, 1]} : vector<1x96xf32> to vector<1x32xf32>
    %46 = vector.extract_strided_slice %44 {offsets = [0, 32], sizes = [1, 32], strides = [1, 1]} : vector<1x96xf32> to vector<1x32xf32>
    %47 = vector.extract_strided_slice %44 {offsets = [0, 64], sizes = [1, 32], strides = [1, 1]} : vector<1x96xf32> to vector<1x32xf32>
    %48 = vector.extract_strided_slice %38 {offsets = [0, 96], sizes = [1, 32], strides = [1, 1]} : vector<1x128xf32> to vector<1x32xf32>
    %49 = math.tanh %48 : vector<1x32xf32>
    %50 = arith.mulf %46, %13 : vector<1x32xf32>
    %51 = arith.mulf %45, %49 : vector<1x32xf32>
    %52 = arith.addf %50, %51 : vector<1x32xf32>
    %53 = math.tanh %52 : vector<1x32xf32>
    %54 = arith.mulf %47, %53 : vector<1x32xf32>
    %c1 = arith.constant 1 : index
    %c0_20 = arith.constant 0 : index
    %55 = vector.load %arg7[%c1, %c0_20] : memref<8x256xf32, #tpu.memory_space<vmem>>, vector<1x256xf32>
    %56 = arith.addf %55, %35 : vector<1x256xf32>
    %57 = vector.extract_strided_slice %56 {offsets = [0, 0], sizes = [1, 192], strides = [1, 1]} : vector<1x256xf32> to vector<1x192xf32>
    %58 = arith.negf %57 : vector<1x192xf32>
    %59 = math.exp %58 : vector<1x192xf32>
    %cst_21 = arith.constant 1.000000e+00 : f32
    %60 = vector.broadcast %cst_21 : f32 to vector<1x192xf32>
    %61 = arith.addf %60, %59 : vector<1x192xf32>
    %62 = arith.divf %60, %61 : vector<1x192xf32>
    %63 = vector.extract_strided_slice %62 {offsets = [0, 0], sizes = [1, 64], strides = [1, 1]} : vector<1x192xf32> to vector<1x64xf32>
    %64 = vector.extract_strided_slice %62 {offsets = [0, 64], sizes = [1, 64], strides = [1, 1]} : vector<1x192xf32> to vector<1x64xf32>
    %65 = vector.extract_strided_slice %62 {offsets = [0, 128], sizes = [1, 64], strides = [1, 1]} : vector<1x192xf32> to vector<1x64xf32>
    %66 = vector.extract_strided_slice %56 {offsets = [0, 192], sizes = [1, 64], strides = [1, 1]} : vector<1x256xf32> to vector<1x64xf32>
    %67 = math.tanh %66 : vector<1x64xf32>
    %68 = arith.mulf %64, %29 : vector<1x64xf32>
    %69 = arith.mulf %63, %67 : vector<1x64xf32>
    %70 = arith.addf %68, %69 : vector<1x64xf32>
    %71 = math.tanh %70 : vector<1x64xf32>
    %72 = arith.mulf %65, %71 : vector<1x64xf32>
    %73 = tpu.concatenate %72, %54 in 1 : vector<1x64xf32>, vector<1x32xf32> -> vector<1x96xf32>
    %c0_22 = arith.constant 0 : index
    %c0_23 = arith.constant 0 : index
    %74 = vector.load %arg4[%c0_22, %c0_23] : memref<96x384xf32, #tpu.memory_space<vmem>>, vector<96x384xf32>
    %cst_24 = arith.constant dense<0.000000e+00> : vector<1x384xf32>
    %75 = tpu.matmul %73, %74, %cst_24 {dimension_numbers = #tpu.dot_dimension_numbers<[1], [0], [0], [1], [0, 0, 1, 1], [], []>} : vector<1x96xf32>, vector<96x384xf32>, vector<1x384xf32> -> vector<1x384xf32>
    %76 = vector.extract_strided_slice %75 {offsets = [0, 0], sizes = [1, 256], strides = [1, 1]} : vector<1x384xf32> to vector<1x256xf32>
    %77 = vector.extract_strided_slice %75 {offsets = [0, 256], sizes = [1, 128], strides = [1, 1]} : vector<1x384xf32> to vector<1x128xf32>
    %c0_25 = arith.constant 0 : index
    %c0_26 = arith.constant 0 : index
    %78 = vector.load %arg5[%c0_25, %c0_26] : memref<1x128xf32, #tpu.memory_space<vmem>>, vector<1x128xf32>
    %79 = arith.addf %77, %78 : vector<1x128xf32>
    %80 = vector.extract_strided_slice %79 {offsets = [0, 0], sizes = [1, 96], strides = [1, 1]} : vector<1x128xf32> to vector<1x96xf32>
    %81 = arith.negf %80 : vector<1x96xf32>
    %82 = math.exp %81 : vector<1x96xf32>
    %cst_27 = arith.constant 1.000000e+00 : f32
    %83 = vector.broadcast %cst_27 : f32 to vector<1x96xf32>
    %84 = arith.addf %83, %82 : vector<1x96xf32>
    %85 = arith.divf %83, %84 : vector<1x96xf32>
    %86 = vector.extract_strided_slice %85 {offsets = [0, 0], sizes = [1, 32], strides = [1, 1]} : vector<1x96xf32> to vector<1x32xf32>
    %87 = vector.extract_strided_slice %85 {offsets = [0, 32], sizes = [1, 32], strides = [1, 1]} : vector<1x96xf32> to vector<1x32xf32>
    %88 = vector.extract_strided_slice %85 {offsets = [0, 64], sizes = [1, 32], strides = [1, 1]} : vector<1x96xf32> to vector<1x32xf32>
    %89 = vector.extract_strided_slice %79 {offsets = [0, 96], sizes = [1, 32], strides = [1, 1]} : vector<1x128xf32> to vector<1x32xf32>
    %90 = math.tanh %89 : vector<1x32xf32>
    %91 = arith.mulf %87, %52 : vector<1x32xf32>
    %92 = arith.mulf %86, %90 : vector<1x32xf32>
    %93 = arith.addf %91, %92 : vector<1x32xf32>
    %94 = math.tanh %93 : vector<1x32xf32>
    %95 = arith.mulf %88, %94 : vector<1x32xf32>
    %c2 = arith.constant 2 : index
    %c0_28 = arith.constant 0 : index
    %96 = vector.load %arg7[%c2, %c0_28] : memref<8x256xf32, #tpu.memory_space<vmem>>, vector<1x256xf32>
    %97 = arith.addf %96, %76 : vector<1x256xf32>
    %98 = vector.extract_strided_slice %97 {offsets = [0, 0], sizes = [1, 192], strides = [1, 1]} : vector<1x256xf32> to vector<1x192xf32>
    %99 = arith.negf %98 : vector<1x192xf32>
    %100 = math.exp %99 : vector<1x192xf32>
    %cst_29 = arith.constant 1.000000e+00 : f32
    %101 = vector.broadcast %cst_29 : f32 to vector<1x192xf32>
    %102 = arith.addf %101, %100 : vector<1x192xf32>
    %103 = arith.divf %101, %102 : vector<1x192xf32>
    %104 = vector.extract_strided_slice %103 {offsets = [0, 0], sizes = [1, 64], strides = [1, 1]} : vector<1x192xf32> to vector<1x64xf32>
    %105 = vector.extract_strided_slice %103 {offsets = [0, 64], sizes = [1, 64], strides = [1, 1]} : vector<1x192xf32> to vector<1x64xf32>
    %106 = vector.extract_strided_slice %103 {offsets = [0, 128], sizes = [1, 64], strides = [1, 1]} : vector<1x192xf32> to vector<1x64xf32>
    %107 = vector.extract_strided_slice %97 {offsets = [0, 192], sizes = [1, 64], strides = [1, 1]} : vector<1x256xf32> to vector<1x64xf32>
    %108 = math.tanh %107 : vector<1x64xf32>
    %109 = arith.mulf %105, %70 : vector<1x64xf32>
    %110 = arith.mulf %104, %108 : vector<1x64xf32>
    %111 = arith.addf %109, %110 : vector<1x64xf32>
    %112 = math.tanh %111 : vector<1x64xf32>
    %113 = arith.mulf %106, %112 : vector<1x64xf32>
    %114 = tpu.concatenate %113, %95 in 1 : vector<1x64xf32>, vector<1x32xf32> -> vector<1x96xf32>
    %c0_30 = arith.constant 0 : index
    %c0_31 = arith.constant 0 : index
    %115 = vector.load %arg4[%c0_30, %c0_31] : memref<96x384xf32, #tpu.memory_space<vmem>>, vector<96x384xf32>
    %cst_32 = arith.constant dense<0.000000e+00> : vector<1x384xf32>
    %116 = tpu.matmul %114, %115, %cst_32 {dimension_numbers = #tpu.dot_dimension_numbers<[1], [0], [0], [1], [0, 0, 1, 1], [], []>} : vector<1x96xf32>, vector<96x384xf32>, vector<1x384xf32> -> vector<1x384xf32>
    %117 = vector.extract_strided_slice %116 {offsets = [0, 0], sizes = [1, 256], strides = [1, 1]} : vector<1x384xf32> to vector<1x256xf32>
    %118 = vector.extract_strided_slice %116 {offsets = [0, 256], sizes = [1, 128], strides = [1, 1]} : vector<1x384xf32> to vector<1x128xf32>
    %c0_33 = arith.constant 0 : index
    %c0_34 = arith.constant 0 : index
    %119 = vector.load %arg5[%c0_33, %c0_34] : memref<1x128xf32, #tpu.memory_space<vmem>>, vector<1x128xf32>
    %120 = arith.addf %118, %119 : vector<1x128xf32>
    %121 = vector.extract_strided_slice %120 {offsets = [0, 0], sizes = [1, 96], strides = [1, 1]} : vector<1x128xf32> to vector<1x96xf32>
    %122 = arith.negf %121 : vector<1x96xf32>
    %123 = math.exp %122 : vector<1x96xf32>
    %cst_35 = arith.constant 1.000000e+00 : f32
    %124 = vector.broadcast %cst_35 : f32 to vector<1x96xf32>
    %125 = arith.addf %124, %123 : vector<1x96xf32>
    %126 = arith.divf %124, %125 : vector<1x96xf32>
    %127 = vector.extract_strided_slice %126 {offsets = [0, 0], sizes = [1, 32], strides = [1, 1]} : vector<1x96xf32> to vector<1x32xf32>
    %128 = vector.extract_strided_slice %126 {offsets = [0, 32], sizes = [1, 32], strides = [1, 1]} : vector<1x96xf32> to vector<1x32xf32>
    %129 = vector.extract_strided_slice %126 {offsets = [0, 64], sizes = [1, 32], strides = [1, 1]} : vector<1x96xf32> to vector<1x32xf32>
    %130 = vector.extract_strided_slice %120 {offsets = [0, 96], sizes = [1, 32], strides = [1, 1]} : vector<1x128xf32> to vector<1x32xf32>
    %131 = math.tanh %130 : vector<1x32xf32>
    %132 = arith.mulf %128, %93 : vector<1x32xf32>
    %133 = arith.mulf %127, %131 : vector<1x32xf32>
    %134 = arith.addf %132, %133 : vector<1x32xf32>
    %135 = math.tanh %134 : vector<1x32xf32>
    %136 = arith.mulf %129, %135 : vector<1x32xf32>
    %c3 = arith.constant 3 : index
    %c0_36 = arith.constant 0 : index
    %137 = vector.load %arg7[%c3, %c0_36] : memref<8x256xf32, #tpu.memory_space<vmem>>, vector<1x256xf32>
    %138 = arith.addf %137, %117 : vector<1x256xf32>
    %139 = vector.extract_strided_slice %138 {offsets = [0, 0], sizes = [1, 192], strides = [1, 1]} : vector<1x256xf32> to vector<1x192xf32>
    %140 = arith.negf %139 : vector<1x192xf32>
    %141 = math.exp %140 : vector<1x192xf32>
    %cst_37 = arith.constant 1.000000e+00 : f32
    %142 = vector.broadcast %cst_37 : f32 to vector<1x192xf32>
    %143 = arith.addf %142, %141 : vector<1x192xf32>
    %144 = arith.divf %142, %143 : vector<1x192xf32>
    %145 = vector.extract_strided_slice %144 {offsets = [0, 0], sizes = [1, 64], strides = [1, 1]} : vector<1x192xf32> to vector<1x64xf32>
    %146 = vector.extract_strided_slice %144 {offsets = [0, 64], sizes = [1, 64], strides = [1, 1]} : vector<1x192xf32> to vector<1x64xf32>
    %147 = vector.extract_strided_slice %144 {offsets = [0, 128], sizes = [1, 64], strides = [1, 1]} : vector<1x192xf32> to vector<1x64xf32>
    %148 = vector.extract_strided_slice %138 {offsets = [0, 192], sizes = [1, 64], strides = [1, 1]} : vector<1x256xf32> to vector<1x64xf32>
    %149 = math.tanh %148 : vector<1x64xf32>
    %150 = arith.mulf %146, %111 : vector<1x64xf32>
    %151 = arith.mulf %145, %149 : vector<1x64xf32>
    %152 = arith.addf %150, %151 : vector<1x64xf32>
    %153 = math.tanh %152 : vector<1x64xf32>
    %154 = arith.mulf %147, %153 : vector<1x64xf32>
    %155 = tpu.concatenate %154, %136 in 1 : vector<1x64xf32>, vector<1x32xf32> -> vector<1x96xf32>
    %c0_38 = arith.constant 0 : index
    %c0_39 = arith.constant 0 : index
    %156 = vector.load %arg4[%c0_38, %c0_39] : memref<96x384xf32, #tpu.memory_space<vmem>>, vector<96x384xf32>
    %cst_40 = arith.constant dense<0.000000e+00> : vector<1x384xf32>
    %157 = tpu.matmul %155, %156, %cst_40 {dimension_numbers = #tpu.dot_dimension_numbers<[1], [0], [0], [1], [0, 0, 1, 1], [], []>} : vector<1x96xf32>, vector<96x384xf32>, vector<1x384xf32> -> vector<1x384xf32>
    %158 = vector.extract_strided_slice %157 {offsets = [0, 0], sizes = [1, 256], strides = [1, 1]} : vector<1x384xf32> to vector<1x256xf32>
    %159 = vector.extract_strided_slice %157 {offsets = [0, 256], sizes = [1, 128], strides = [1, 1]} : vector<1x384xf32> to vector<1x128xf32>
    %c0_41 = arith.constant 0 : index
    %c0_42 = arith.constant 0 : index
    %160 = vector.load %arg5[%c0_41, %c0_42] : memref<1x128xf32, #tpu.memory_space<vmem>>, vector<1x128xf32>
    %161 = arith.addf %159, %160 : vector<1x128xf32>
    %162 = vector.extract_strided_slice %161 {offsets = [0, 0], sizes = [1, 96], strides = [1, 1]} : vector<1x128xf32> to vector<1x96xf32>
    %163 = arith.negf %162 : vector<1x96xf32>
    %164 = math.exp %163 : vector<1x96xf32>
    %cst_43 = arith.constant 1.000000e+00 : f32
    %165 = vector.broadcast %cst_43 : f32 to vector<1x96xf32>
    %166 = arith.addf %165, %164 : vector<1x96xf32>
    %167 = arith.divf %165, %166 : vector<1x96xf32>
    %168 = vector.extract_strided_slice %167 {offsets = [0, 0], sizes = [1, 32], strides = [1, 1]} : vector<1x96xf32> to vector<1x32xf32>
    %169 = vector.extract_strided_slice %167 {offsets = [0, 32], sizes = [1, 32], strides = [1, 1]} : vector<1x96xf32> to vector<1x32xf32>
    %170 = vector.extract_strided_slice %167 {offsets = [0, 64], sizes = [1, 32], strides = [1, 1]} : vector<1x96xf32> to vector<1x32xf32>
    %171 = vector.extract_strided_slice %161 {offsets = [0, 96], sizes = [1, 32], strides = [1, 1]} : vector<1x128xf32> to vector<1x32xf32>
    %172 = math.tanh %171 : vector<1x32xf32>
    %173 = arith.mulf %169, %134 : vector<1x32xf32>
    %174 = arith.mulf %168, %172 : vector<1x32xf32>
    %175 = arith.addf %173, %174 : vector<1x32xf32>
    %176 = math.tanh %175 : vector<1x32xf32>
    %177 = arith.mulf %170, %176 : vector<1x32xf32>
    %c4 = arith.constant 4 : index
    %c0_44 = arith.constant 0 : index
    %178 = vector.load %arg7[%c4, %c0_44] : memref<8x256xf32, #tpu.memory_space<vmem>>, vector<1x256xf32>
    %179 = arith.addf %178, %158 : vector<1x256xf32>
    %180 = vector.extract_strided_slice %179 {offsets = [0, 0], sizes = [1, 192], strides = [1, 1]} : vector<1x256xf32> to vector<1x192xf32>
    %181 = arith.negf %180 : vector<1x192xf32>
    %182 = math.exp %181 : vector<1x192xf32>
    %cst_45 = arith.constant 1.000000e+00 : f32
    %183 = vector.broadcast %cst_45 : f32 to vector<1x192xf32>
    %184 = arith.addf %183, %182 : vector<1x192xf32>
    %185 = arith.divf %183, %184 : vector<1x192xf32>
    %186 = vector.extract_strided_slice %185 {offsets = [0, 0], sizes = [1, 64], strides = [1, 1]} : vector<1x192xf32> to vector<1x64xf32>
    %187 = vector.extract_strided_slice %185 {offsets = [0, 64], sizes = [1, 64], strides = [1, 1]} : vector<1x192xf32> to vector<1x64xf32>
    %188 = vector.extract_strided_slice %185 {offsets = [0, 128], sizes = [1, 64], strides = [1, 1]} : vector<1x192xf32> to vector<1x64xf32>
    %189 = vector.extract_strided_slice %179 {offsets = [0, 192], sizes = [1, 64], strides = [1, 1]} : vector<1x256xf32> to vector<1x64xf32>
    %190 = math.tanh %189 : vector<1x64xf32>
    %191 = arith.mulf %187, %152 : vector<1x64xf32>
    %192 = arith.mulf %186, %190 : vector<1x64xf32>
    %193 = arith.addf %191, %192 : vector<1x64xf32>
    %194 = math.tanh %193 : vector<1x64xf32>
    %195 = arith.mulf %188, %194 : vector<1x64xf32>
    %196 = tpu.concatenate %195, %177 in 1 : vector<1x64xf32>, vector<1x32xf32> -> vector<1x96xf32>
    %c0_46 = arith.constant 0 : index
    %c0_47 = arith.constant 0 : index
    %197 = vector.load %arg4[%c0_46, %c0_47] : memref<96x384xf32, #tpu.memory_space<vmem>>, vector<96x384xf32>
    %cst_48 = arith.constant dense<0.000000e+00> : vector<1x384xf32>
    %198 = tpu.matmul %196, %197, %cst_48 {dimension_numbers = #tpu.dot_dimension_numbers<[1], [0], [0], [1], [0, 0, 1, 1], [], []>} : vector<1x96xf32>, vector<96x384xf32>, vector<1x384xf32> -> vector<1x384xf32>
    %199 = vector.extract_strided_slice %198 {offsets = [0, 0], sizes = [1, 256], strides = [1, 1]} : vector<1x384xf32> to vector<1x256xf32>
    %200 = vector.extract_strided_slice %198 {offsets = [0, 256], sizes = [1, 128], strides = [1, 1]} : vector<1x384xf32> to vector<1x128xf32>
    %c0_49 = arith.constant 0 : index
    %c0_50 = arith.constant 0 : index
    %201 = vector.load %arg5[%c0_49, %c0_50] : memref<1x128xf32, #tpu.memory_space<vmem>>, vector<1x128xf32>
    %202 = arith.addf %200, %201 : vector<1x128xf32>
    %203 = vector.extract_strided_slice %202 {offsets = [0, 0], sizes = [1, 96], strides = [1, 1]} : vector<1x128xf32> to vector<1x96xf32>
    %204 = arith.negf %203 : vector<1x96xf32>
    %205 = math.exp %204 : vector<1x96xf32>
    %cst_51 = arith.constant 1.000000e+00 : f32
    %206 = vector.broadcast %cst_51 : f32 to vector<1x96xf32>
    %207 = arith.addf %206, %205 : vector<1x96xf32>
    %208 = arith.divf %206, %207 : vector<1x96xf32>
    %209 = vector.extract_strided_slice %208 {offsets = [0, 0], sizes = [1, 32], strides = [1, 1]} : vector<1x96xf32> to vector<1x32xf32>
    %210 = vector.extract_strided_slice %208 {offsets = [0, 32], sizes = [1, 32], strides = [1, 1]} : vector<1x96xf32> to vector<1x32xf32>
    %211 = vector.extract_strided_slice %208 {offsets = [0, 64], sizes = [1, 32], strides = [1, 1]} : vector<1x96xf32> to vector<1x32xf32>
    %212 = vector.extract_strided_slice %202 {offsets = [0, 96], sizes = [1, 32], strides = [1, 1]} : vector<1x128xf32> to vector<1x32xf32>
    %213 = math.tanh %212 : vector<1x32xf32>
    %214 = arith.mulf %210, %175 : vector<1x32xf32>
    %215 = arith.mulf %209, %213 : vector<1x32xf32>
    %216 = arith.addf %214, %215 : vector<1x32xf32>
    %217 = math.tanh %216 : vector<1x32xf32>
    %218 = arith.mulf %211, %217 : vector<1x32xf32>
    %c5 = arith.constant 5 : index
    %c0_52 = arith.constant 0 : index
    %219 = vector.load %arg7[%c5, %c0_52] : memref<8x256xf32, #tpu.memory_space<vmem>>, vector<1x256xf32>
    %220 = arith.addf %219, %199 : vector<1x256xf32>
    %221 = vector.extract_strided_slice %220 {offsets = [0, 0], sizes = [1, 192], strides = [1, 1]} : vector<1x256xf32> to vector<1x192xf32>
    %222 = arith.negf %221 : vector<1x192xf32>
    %223 = math.exp %222 : vector<1x192xf32>
    %cst_53 = arith.constant 1.000000e+00 : f32
    %224 = vector.broadcast %cst_53 : f32 to vector<1x192xf32>
    %225 = arith.addf %224, %223 : vector<1x192xf32>
    %226 = arith.divf %224, %225 : vector<1x192xf32>
    %227 = vector.extract_strided_slice %226 {offsets = [0, 0], sizes = [1, 64], strides = [1, 1]} : vector<1x192xf32> to vector<1x64xf32>
    %228 = vector.extract_strided_slice %226 {offsets = [0, 64], sizes = [1, 64], strides = [1, 1]} : vector<1x192xf32> to vector<1x64xf32>
    %229 = vector.extract_strided_slice %226 {offsets = [0, 128], sizes = [1, 64], strides = [1, 1]} : vector<1x192xf32> to vector<1x64xf32>
    %230 = vector.extract_strided_slice %220 {offsets = [0, 192], sizes = [1, 64], strides = [1, 1]} : vector<1x256xf32> to vector<1x64xf32>
    %231 = math.tanh %230 : vector<1x64xf32>
    %232 = arith.mulf %228, %193 : vector<1x64xf32>
    %233 = arith.mulf %227, %231 : vector<1x64xf32>
    %234 = arith.addf %232, %233 : vector<1x64xf32>
    %235 = math.tanh %234 : vector<1x64xf32>
    %236 = arith.mulf %229, %235 : vector<1x64xf32>
    %237 = tpu.concatenate %236, %218 in 1 : vector<1x64xf32>, vector<1x32xf32> -> vector<1x96xf32>
    %c0_54 = arith.constant 0 : index
    %c0_55 = arith.constant 0 : index
    %238 = vector.load %arg4[%c0_54, %c0_55] : memref<96x384xf32, #tpu.memory_space<vmem>>, vector<96x384xf32>
    %cst_56 = arith.constant dense<0.000000e+00> : vector<1x384xf32>
    %239 = tpu.matmul %237, %238, %cst_56 {dimension_numbers = #tpu.dot_dimension_numbers<[1], [0], [0], [1], [0, 0, 1, 1], [], []>} : vector<1x96xf32>, vector<96x384xf32>, vector<1x384xf32> -> vector<1x384xf32>
    %240 = vector.extract_strided_slice %239 {offsets = [0, 0], sizes = [1, 256], strides = [1, 1]} : vector<1x384xf32> to vector<1x256xf32>
    %241 = vector.extract_strided_slice %239 {offsets = [0, 256], sizes = [1, 128], strides = [1, 1]} : vector<1x384xf32> to vector<1x128xf32>
    %c0_57 = arith.constant 0 : index
    %c0_58 = arith.constant 0 : index
    %242 = vector.load %arg5[%c0_57, %c0_58] : memref<1x128xf32, #tpu.memory_space<vmem>>, vector<1x128xf32>
    %243 = arith.addf %241, %242 : vector<1x128xf32>
    %244 = vector.extract_strided_slice %243 {offsets = [0, 0], sizes = [1, 96], strides = [1, 1]} : vector<1x128xf32> to vector<1x96xf32>
    %245 = arith.negf %244 : vector<1x96xf32>
    %246 = math.exp %245 : vector<1x96xf32>
    %cst_59 = arith.constant 1.000000e+00 : f32
    %247 = vector.broadcast %cst_59 : f32 to vector<1x96xf32>
    %248 = arith.addf %247, %246 : vector<1x96xf32>
    %249 = arith.divf %247, %248 : vector<1x96xf32>
    %250 = vector.extract_strided_slice %249 {offsets = [0, 0], sizes = [1, 32], strides = [1, 1]} : vector<1x96xf32> to vector<1x32xf32>
    %251 = vector.extract_strided_slice %249 {offsets = [0, 32], sizes = [1, 32], strides = [1, 1]} : vector<1x96xf32> to vector<1x32xf32>
    %252 = vector.extract_strided_slice %249 {offsets = [0, 64], sizes = [1, 32], strides = [1, 1]} : vector<1x96xf32> to vector<1x32xf32>
    %253 = vector.extract_strided_slice %243 {offsets = [0, 96], sizes = [1, 32], strides = [1, 1]} : vector<1x128xf32> to vector<1x32xf32>
    %254 = math.tanh %253 : vector<1x32xf32>
    %255 = arith.mulf %251, %216 : vector<1x32xf32>
    %256 = arith.mulf %250, %254 : vector<1x32xf32>
    %257 = arith.addf %255, %256 : vector<1x32xf32>
    %258 = math.tanh %257 : vector<1x32xf32>
    %259 = arith.mulf %252, %258 : vector<1x32xf32>
    %c6 = arith.constant 6 : index
    %c0_60 = arith.constant 0 : index
    %260 = vector.load %arg7[%c6, %c0_60] : memref<8x256xf32, #tpu.memory_space<vmem>>, vector<1x256xf32>
    %261 = arith.addf %260, %240 : vector<1x256xf32>
    %262 = vector.extract_strided_slice %261 {offsets = [0, 0], sizes = [1, 192], strides = [1, 1]} : vector<1x256xf32> to vector<1x192xf32>
    %263 = arith.negf %262 : vector<1x192xf32>
    %264 = math.exp %263 : vector<1x192xf32>
    %cst_61 = arith.constant 1.000000e+00 : f32
    %265 = vector.broadcast %cst_61 : f32 to vector<1x192xf32>
    %266 = arith.addf %265, %264 : vector<1x192xf32>
    %267 = arith.divf %265, %266 : vector<1x192xf32>
    %268 = vector.extract_strided_slice %267 {offsets = [0, 0], sizes = [1, 64], strides = [1, 1]} : vector<1x192xf32> to vector<1x64xf32>
    %269 = vector.extract_strided_slice %267 {offsets = [0, 64], sizes = [1, 64], strides = [1, 1]} : vector<1x192xf32> to vector<1x64xf32>
    %270 = vector.extract_strided_slice %267 {offsets = [0, 128], sizes = [1, 64], strides = [1, 1]} : vector<1x192xf32> to vector<1x64xf32>
    %271 = vector.extract_strided_slice %261 {offsets = [0, 192], sizes = [1, 64], strides = [1, 1]} : vector<1x256xf32> to vector<1x64xf32>
    %272 = math.tanh %271 : vector<1x64xf32>
    %273 = arith.mulf %269, %234 : vector<1x64xf32>
    %274 = arith.mulf %268, %272 : vector<1x64xf32>
    %275 = arith.addf %273, %274 : vector<1x64xf32>
    %276 = math.tanh %275 : vector<1x64xf32>
    %277 = arith.mulf %270, %276 : vector<1x64xf32>
    %278 = tpu.concatenate %277, %259 in 1 : vector<1x64xf32>, vector<1x32xf32> -> vector<1x96xf32>
    %c0_62 = arith.constant 0 : index
    %c0_63 = arith.constant 0 : index
    %279 = vector.load %arg4[%c0_62, %c0_63] : memref<96x384xf32, #tpu.memory_space<vmem>>, vector<96x384xf32>
    %cst_64 = arith.constant dense<0.000000e+00> : vector<1x384xf32>
    %280 = tpu.matmul %278, %279, %cst_64 {dimension_numbers = #tpu.dot_dimension_numbers<[1], [0], [0], [1], [0, 0, 1, 1], [], []>} : vector<1x96xf32>, vector<96x384xf32>, vector<1x384xf32> -> vector<1x384xf32>
    %281 = vector.extract_strided_slice %280 {offsets = [0, 0], sizes = [1, 256], strides = [1, 1]} : vector<1x384xf32> to vector<1x256xf32>
    %282 = vector.extract_strided_slice %280 {offsets = [0, 256], sizes = [1, 128], strides = [1, 1]} : vector<1x384xf32> to vector<1x128xf32>
    %c0_65 = arith.constant 0 : index
    %c0_66 = arith.constant 0 : index
    %283 = vector.load %arg5[%c0_65, %c0_66] : memref<1x128xf32, #tpu.memory_space<vmem>>, vector<1x128xf32>
    %284 = arith.addf %282, %283 : vector<1x128xf32>
    %285 = vector.extract_strided_slice %284 {offsets = [0, 0], sizes = [1, 96], strides = [1, 1]} : vector<1x128xf32> to vector<1x96xf32>
    %286 = arith.negf %285 : vector<1x96xf32>
    %287 = math.exp %286 : vector<1x96xf32>
    %cst_67 = arith.constant 1.000000e+00 : f32
    %288 = vector.broadcast %cst_67 : f32 to vector<1x96xf32>
    %289 = arith.addf %288, %287 : vector<1x96xf32>
    %290 = arith.divf %288, %289 : vector<1x96xf32>
    %291 = vector.extract_strided_slice %290 {offsets = [0, 0], sizes = [1, 32], strides = [1, 1]} : vector<1x96xf32> to vector<1x32xf32>
    %292 = vector.extract_strided_slice %290 {offsets = [0, 32], sizes = [1, 32], strides = [1, 1]} : vector<1x96xf32> to vector<1x32xf32>
    %293 = vector.extract_strided_slice %290 {offsets = [0, 64], sizes = [1, 32], strides = [1, 1]} : vector<1x96xf32> to vector<1x32xf32>
    %294 = vector.extract_strided_slice %284 {offsets = [0, 96], sizes = [1, 32], strides = [1, 1]} : vector<1x128xf32> to vector<1x32xf32>
    %295 = math.tanh %294 : vector<1x32xf32>
    %296 = arith.mulf %292, %257 : vector<1x32xf32>
    %297 = arith.mulf %291, %295 : vector<1x32xf32>
    %298 = arith.addf %296, %297 : vector<1x32xf32>
    %299 = math.tanh %298 : vector<1x32xf32>
    %300 = arith.mulf %293, %299 : vector<1x32xf32>
    %c7 = arith.constant 7 : index
    %c0_68 = arith.constant 0 : index
    %301 = vector.load %arg7[%c7, %c0_68] : memref<8x256xf32, #tpu.memory_space<vmem>>, vector<1x256xf32>
    %302 = arith.addf %301, %281 : vector<1x256xf32>
    %303 = vector.extract_strided_slice %302 {offsets = [0, 0], sizes = [1, 192], strides = [1, 1]} : vector<1x256xf32> to vector<1x192xf32>
    %304 = arith.negf %303 : vector<1x192xf32>
    %305 = math.exp %304 : vector<1x192xf32>
    %cst_69 = arith.constant 1.000000e+00 : f32
    %306 = vector.broadcast %cst_69 : f32 to vector<1x192xf32>
    %307 = arith.addf %306, %305 : vector<1x192xf32>
    %308 = arith.divf %306, %307 : vector<1x192xf32>
    %309 = vector.extract_strided_slice %308 {offsets = [0, 0], sizes = [1, 64], strides = [1, 1]} : vector<1x192xf32> to vector<1x64xf32>
    %310 = vector.extract_strided_slice %308 {offsets = [0, 64], sizes = [1, 64], strides = [1, 1]} : vector<1x192xf32> to vector<1x64xf32>
    %311 = vector.extract_strided_slice %308 {offsets = [0, 128], sizes = [1, 64], strides = [1, 1]} : vector<1x192xf32> to vector<1x64xf32>
    %312 = vector.extract_strided_slice %302 {offsets = [0, 192], sizes = [1, 64], strides = [1, 1]} : vector<1x256xf32> to vector<1x64xf32>
    %313 = math.tanh %312 : vector<1x64xf32>
    %314 = arith.mulf %310, %275 : vector<1x64xf32>
    %315 = arith.mulf %309, %313 : vector<1x64xf32>
    %316 = arith.addf %314, %315 : vector<1x64xf32>
    %317 = math.tanh %316 : vector<1x64xf32>
    %318 = arith.mulf %311, %317 : vector<1x64xf32>
    %319 = tpu.concatenate %318, %300 in 1 : vector<1x64xf32>, vector<1x32xf32> -> vector<1x96xf32>
    %c0_70 = arith.constant 0 : index
    %c0_71 = arith.constant 0 : index
    %320 = vector.load %arg4[%c0_70, %c0_71] : memref<96x384xf32, #tpu.memory_space<vmem>>, vector<96x384xf32>
    %cst_72 = arith.constant dense<0.000000e+00> : vector<1x384xf32>
    %321 = tpu.matmul %319, %320, %cst_72 {dimension_numbers = #tpu.dot_dimension_numbers<[1], [0], [0], [1], [0, 0, 1, 1], [], []>} : vector<1x96xf32>, vector<96x384xf32>, vector<1x384xf32> -> vector<1x384xf32>
    %322 = vector.extract_strided_slice %321 {offsets = [0, 256], sizes = [1, 128], strides = [1, 1]} : vector<1x384xf32> to vector<1x128xf32>
    %c0_73 = arith.constant 0 : index
    %c0_74 = arith.constant 0 : index
    %323 = vector.load %arg5[%c0_73, %c0_74] : memref<1x128xf32, #tpu.memory_space<vmem>>, vector<1x128xf32>
    %324 = arith.addf %322, %323 : vector<1x128xf32>
    %325 = vector.extract_strided_slice %324 {offsets = [0, 0], sizes = [1, 96], strides = [1, 1]} : vector<1x128xf32> to vector<1x96xf32>
    %326 = arith.negf %325 : vector<1x96xf32>
    %327 = math.exp %326 : vector<1x96xf32>
    %cst_75 = arith.constant 1.000000e+00 : f32
    %328 = vector.broadcast %cst_75 : f32 to vector<1x96xf32>
    %329 = arith.addf %328, %327 : vector<1x96xf32>
    %330 = arith.divf %328, %329 : vector<1x96xf32>
    %331 = vector.extract_strided_slice %330 {offsets = [0, 0], sizes = [1, 32], strides = [1, 1]} : vector<1x96xf32> to vector<1x32xf32>
    %332 = vector.extract_strided_slice %330 {offsets = [0, 32], sizes = [1, 32], strides = [1, 1]} : vector<1x96xf32> to vector<1x32xf32>
    %333 = vector.extract_strided_slice %330 {offsets = [0, 64], sizes = [1, 32], strides = [1, 1]} : vector<1x96xf32> to vector<1x32xf32>
    %334 = vector.extract_strided_slice %324 {offsets = [0, 96], sizes = [1, 32], strides = [1, 1]} : vector<1x128xf32> to vector<1x32xf32>
    %335 = math.tanh %334 : vector<1x32xf32>
    %336 = arith.mulf %332, %298 : vector<1x32xf32>
    %337 = arith.mulf %331, %335 : vector<1x32xf32>
    %338 = arith.addf %336, %337 : vector<1x32xf32>
    %339 = math.tanh %338 : vector<1x32xf32>
    %340 = arith.mulf %333, %339 : vector<1x32xf32>
    %341 = vector.shape_cast %340 : vector<1x32xf32> to vector<1x1x32xf32>
    %c0_76 = arith.constant 0 : index
    %c0_77 = arith.constant 0 : index
    %c0_78 = arith.constant 0 : index
    %342 = vector.load %arg6[%c0_76, %c0_77, %c0_78] : memref<1x1x32xf32, #tpu.memory_space<vmem>>, vector<1x1x32xf32>
    tpu.vector_store %arg6[%c0_76, %c0_77, %c0_78], %341 {strides = array<i32>} : memref<1x1x32xf32, #tpu.memory_space<vmem>>, vector<1x1x32xf32>,
    return
  }
  func.func @transform_0(%arg0: i32) -> (i32, i32, i32) {
    %c0_i32 = arith.constant 0 : i32
    %c0_i32_0 = arith.constant 0 : i32
    %c0_i32_1 = arith.constant 0 : i32
    return %arg0, %c0_i32, %c0_i32_0 : i32, i32, i32
  }
  func.func @transform_1(%arg0: i32) -> (i32, i32) {
    %c0_i32 = arith.constant 0 : i32
    %c0_i32_0 = arith.constant 0 : i32
    %c0_i32_1 = arith.constant 0 : i32
    return %c0_i32, %c0_i32_0 : i32, i32
  }
  func.func @transform_2(%arg0: i32) -> (i32, i32) {
    %c0_i32 = arith.constant 0 : i32
    %c0_i32_0 = arith.constant 0 : i32
    %c0_i32_1 = arith.constant 0 : i32
    return %c0_i32, %c0_i32_0 : i32, i32
  }
  func.func @transform_3(%arg0: i32) -> (i32, i32) {
    %c0_i32 = arith.constant 0 : i32
    %c0_i32_0 = arith.constant 0 : i32
    %c0_i32_1 = arith.constant 0 : i32
    return %c0_i32, %c0_i32_0 : i32, i32
  }
  func.func @transform_4(%arg0: i32) -> (i32, i32) {
    %c0_i32 = arith.constant 0 : i32
    %c0_i32_0 = arith.constant 0 : i32
    %c0_i32_1 = arith.constant 0 : i32
    return %c0_i32, %c0_i32_0 : i32, i32
  }
  func.func @transform_5(%arg0: i32) -> (i32, i32, i32) {
    %c0_i32 = arith.constant 0 : i32
    %c0_i32_0 = arith.constant 0 : i32
    %c0_i32_1 = arith.constant 0 : i32
    return %arg0, %c0_i32, %c0_i32_0 : i32, i32, i32
  }
}

</mosaic_0001>

<bundles_post_ra>
// kernel: tpu_custom_call.1
= control target key start
LH: loop header
LB: loop body
LE: loop exit
PB: predicated region body
PF: predicated region fallthrough
CT: control target
= control target key end

     0   :  { %10 = vsyncpa [#allocation4], 0  ;;  %s3123_s0 = inlined_call_operand.vmem [shape: f32[1,8,1], index: 0, kind: input, shape index: {}]   ;;  %s3124_s1 = inlined_call_operand.vmem [shape: f32[1,256], index: 1, kind: input, shape index: {}]   ;;  %s3125_s2 = inlined_call_operand.vmem [shape: f32[1,256], index: 2, kind: input, shape index: {}]   ;;  %s3126_s3 = inlined_call_operand.hbm [shape: f32[96,384], index: 3, kind: input, shape index: {}]   ;;  %s3127_s4 = inlined_call_operand.vmem [shape: f32[1,128], index: 4, kind: input, shape index: {}]   ;;  %s3128_s5 = inlined_call_operand.hbm [shape: f32[1,1,32], index: 5, kind: output, shape index: {}]  }
   0x1   :  { %11 = vsyncpa [#allocation5], 0  ;;  %s2645_s18 = smov [#allocation3]   ;;  %s2597_s22 = scalar_lea.hbm %s3126_s3, 4608 }
   0x2   :  { %s23_s19 = sshll.u32 %s2645_s18, 4  ;;  %p2598_p0 = scmp.ne.s32.totalorder %s3126_s3, %s2597_s22  ;;  %s24_s19 = int_to_ptr.vmem [resolvable:$true] %s23_s19 }
   0x3   :  { %p2601_p1 = scmp.lt.u32.totalorder %s2597_s22, %s3126_s3 }
   0x5   :  { %p2603_p2 = pnand %p2601_p1, %p2598_p0 }
   0x7   :  { %2606 = shalt.err (!%p2603_p2)
}
   0x8   :  { %s2607_s27 = scalar_lea.vmem %s24_s19, 4608  ;;  %p2612_p4 = scmp.lt.s32.totalorder %s24_s19, %s24_s19 }
   0x9   :  { %p2608_p3 = scmp.ne.s32.totalorder %s24_s19, %s2607_s27  ;;  %p2613_p5 = scmp.lt.s32.totalorder %s2607_s27, %s2607_s27 }
   0xb   :  { %p2614_p6 = por %p2613_p5, %p2612_p4 }
   0xd   :  { %p2615_p7 = pnand %p2614_p6, %p2608_p3 }
   0xf   :  { %2618 = shalt.err (!%p2615_p7)
}
  0x10   :  { %s2646_s28 = smov 384   ;;  %s2647_s29 = smov 24  }
  0x11   :  { %29 = dma.hbm_to_vmem [thread:$0]  %s3126_s3, 4608, %s24_s19, [#allocation4], %s2646_s28, %s2646_s28, %s2647_s29  }
  0x12   :  { %2641 = dma.done.wait [#allocation4], 4608  }
  0x13   :  { %2642 = vsyncadd [#allocation4], 4294962688  ;;  %v2648_v0 = vmov 0   ;;  %v35_v1 = vld [vmem:[%s3123_s0] sm:$0xff]  ;;  %v43_v2 = vlaneseq  ;;  %s2649_s0 = smov 64   ;;  %v104_v26 = vld [vmem:[#allocation3 + $0x8] sm:$0xff] }
  0x14   :  { %2467 = vset.pattern.permute.xlu0 %v2648_v0  ;;  %v36_v6 = vld [vmem:[%s3124_s1] sm:$0x3]  ;;  %v107_v27 = vld [vmem:[#allocation3 + $0x20] sm:$0xff]  ;;  %v2650_v30 = vmov 0.0|0.0   ;;  %v106_v31 = vld [vmem:[#allocation3 + $0x18] sm:$0xff]  ;;  %vm2652_vm0 = vmmov 0  }
  0x15   :  { %39 = vperm.xlu0 %2467, %v35_v1   ;;  %v2701_v3 = vshrl.u32 %v43_v2, 7  ;;  %v55_v7 = vld [vmem:[%s3125_s2] sm:$0x3]  ;;  %v103_v28 = vld [vmem:[#allocation3] sm:$0xff]  ;;  %v2716_v29 = vpack.c.bf16 %v107_v27, %v104_v26  ;;  %2168 = vmatprep.subr.bf16.mxu1 %v2650_v30  ;;  %v108_v33 = vld [vmem:[#allocation3 + $0x28] sm:$0xff]  ;;  %vm101_vm1 = vcmask 523264  }
  0x16   :  { %v105_v32 = vld [vmem:[#allocation3 + $0x10] sm:$0xff]  ;;  %v2719_v34 = vpack.c.bf16 %v106_v31, %v103_v28  ;;  %v110_v36 = vld [vmem:[#allocation3 + $0x38] sm:$0xff]  ;;  %v112_v40 = vld [vmem:[#allocation3 + $0x48] sm:$0xff]  ;;  %vm139_vm2 = vcmask 785408   ;;  %s2654_s12 = smov 32   ;;  %vm1776_vm3 = vcmask 253952  }
  0x17   :  { %v45_v4 = vsub.s32 0, %v2701_v3  ;;  %v49_v5 = vsub.s32 1, %v2701_v3  ;;  %v2721_v35 = vpack.c.bf16 %v108_v33, %v105_v32  ;;  %v113_v37 = vld [vmem:[#allocation3 + $0x50] sm:$0xff]  ;;  %2145 = vmatprep.subr.bf16.mxu0 %v2716_v29  ;;  %v111_v41 = vld [vmem:[#allocation3 + $0x40] sm:$0xff]  ;;  %v114_v42 = vld [vmem:[#allocation3 + $0x58] sm:$0xff] }
  0x18   :  { %v109_v38 = vld [vmem:[#allocation3 + $0x30] sm:$0xff]  ;;  %v2724_v39 = vpack.c.bf16 %v113_v37, %v110_v36  ;;  %2147 = vmatpush1.bf16.msra.mxu0 %v2719_v34  ;;  %v2730_v44 = vpack.c.bf16 %v114_v42, %v111_v41  ;;  %v116_v45 = vld [vmem:[#allocation3 + $0x68] sm:$0xff]  ;;  %v119_v46 = vld [vmem:[#allocation3 + $0x80] sm:$0xff] }
  0x19   :  { %v46_v8 = vrot.slane %v36_v6, %v45_v4  ;;  %v50_v9 = vrot.slane %v36_v6, %v49_v5  ;;  %v60_v10 = vrot.slane %v55_v7, %v45_v4  ;;  %v64_v11 = vrot.slane %v55_v7, %v49_v5  ;;  %2170 = vmatpush3.bf16.msra.mxu1 %v2721_v35  ;;  %v115_v47 = vld [vmem:[#allocation3 + $0x60] sm:$0xff]  ;;  %v118_v49 = vld [vmem:[#allocation3 + $0x78] sm:$0xff]  ;;  %v117_v50 = vld [vmem:[#allocation3 + $0x70] sm:$0xff] }
  0x1a   :  { %v2728_v43 = vpack.c.bf16 %v112_v40, %v109_v38  ;;  %2149 = vmatprep.subr.bf16.mxu0 %v2724_v39  ;;  %2171 = vmatprep.subr.bf16.mxu1 %v2650_v30  ;;  %v2734_v48 = vpack.c.bf16 %v119_v46, %v116_v45  ;;  %v120_v51 = vld [vmem:[#allocation3 + $0x88] sm:$0xff]  ;;  %v122_v52 = vld [vmem:[#allocation3 + $0x98] sm:$0xff]  ;;  %v125_v53 = vld [vmem:[#allocation3 + $0xb0] sm:$0xff]  ;;  %v2738_v54 = vpack.c.bf16 %v118_v49, %v115_v47 }
  0x1b   :  { %v2740_v55 = vpack.c.bf16 %v120_v51, %v117_v50  ;;  %v121_v56 = vld [vmem:[#allocation3 + $0x90] sm:$0xff]  ;;  %v2744_v57 = vpack.c.bf16 %v125_v53, %v122_v52  ;;  %v124_v58 = vld [vmem:[#allocation3 + $0xa8] sm:$0xff]  ;;  %v123_v59 = vld [vmem:[#allocation3 + $0xa0] sm:$0xff] }
  0x1c   :  { %2151 = vmatpush1.bf16.msra.mxu0 %v2728_v43  ;;  %v126_v60 = vld [vmem:[#allocation3 + $0xb8] sm:$0xff]  ;;  %v128_v61 = vld [vmem:[#allocation3 + $0xc8] sm:$0xff]  ;;  %v131_v62 = vld [vmem:[#allocation3 + $0xe0] sm:$0xff]  ;;  %v2748_v63 = vpack.c.bf16 %v124_v58, %v121_v56 }
  0x1d   :  { %2173 = vmatpush3.bf16.msra.mxu1 %v2730_v44  ;;  %2153 = vmatprep.subr.bf16.mxu0 %v2734_v48  ;;  %v2750_v0 = vpack.c.bf16 %v126_v60, %v123_v59  ;;  %v127_v1 = vld [vmem:[#allocation3 + $0xc0] sm:$0xff]  ;;  %v2754_v2 = vpack.c.bf16 %v131_v62, %v128_v61  ;;  %v130_v4 = vld [vmem:[#allocation3 + $0xd8] sm:$0xff]  ;;  %v129_v5 = vld [vmem:[#allocation3 + $0xd0] sm:$0xff] }
  0x1e   :  { %2174 = vmatprep.subr.bf16.mxu1 %v2650_v30  ;;  %v132_v6 = vld [vmem:[#allocation3 + $0xe8] sm:$0xff]  ;;  %v134_v7 = vld [vmem:[#allocation3 + $0xf8] sm:$0xff]  ;;  %v2820_v32 = vld [vmem:[%s3127_s4] sm:$0x1] }
  0x20   :  { %2155 = vmatpush1.bf16.msra.mxu0 %v2738_v54 }
  0x21   :  { %2176 = vmatpush3.bf16.msra.mxu1 %v2740_v55  ;;  %2157 = vmatprep.subr.bf16.mxu0 %v2744_v57 }
  0x22   :  { %2177 = vmatprep.subr.bf16.mxu1 %v2650_v30 }
  0x24   :  { %2159 = vmatpush1.bf16.msra.mxu0 %v2748_v63 }
  0x25   :  { %2179 = vmatpush3.bf16.msra.mxu1 %v2750_v0  ;;  %2161 = vmatprep.subr.bf16.mxu0 %v2754_v2 }
  0x26   :  { %2180 = vmatprep.subr.bf16.mxu1 %v2650_v30 }
  0x94   :  { %v40_v12 = vpop.permute.xlu0 %39 }
  0x95   :  { %v53_v13 = vmul.f32 %v46_v8, %v40_v12  ;;  %v54_v14 = vmul.f32 %v50_v9, %v40_v12  ;;  %v137_v8 = vld [vmem:[#allocation3 + $0x110] sm:$0xff]  ;;  %v2758_v9 = vpack.c.bf16 %v130_v4, %v127_v1 }
  0x96   :  { %v133_v12 = vld [vmem:[#allocation3 + $0xf0] sm:$0xff] }
  0x97   :  { %v67_v15 = vadd.f32 %v60_v10, %v53_v13  ;;  %v68_v16 = vadd.f32 %v64_v11, %v54_v14  ;;  %v2760_v10 = vpack.c.bf16 %v132_v6, %v129_v5  ;;  %v2764_v11 = vpack.c.bf16 %v137_v8, %v134_v7  ;;  %2163 = vmatpush1.bf16.msra.mxu0 %v2758_v9  ;;  %v136_v13 = vld [vmem:[#allocation3 + $0x108] sm:$0xff]  ;;  %v135_v14 = vld [vmem:[#allocation3 + $0x100] sm:$0xff] }
  0x99   :  { %69 = vst [vmem:[#allocation2] sm:$0xff] %v67_v15  ;;  %70 = vst [vmem:[#allocation2 + $0x8] sm:$0xff] %v68_v16  ;;  %2182 = vmatpush3.bf16.msra.mxu1 %v2760_v10  ;;  %2165 = vmatprep.subr.bf16.mxu0 %v2764_v11  ;;  %v2771_v16 = vpack.c.bf16 %v136_v13, %v133_v12 }
  0x9a   :  { %2183 = vmatprep.subr.bf16.mxu1 %v2650_v30 }
  0x9b   :  { %2167 = vmatpush1.bf16.msra.mxu0 %v2771_v16 }
  0x9c   :  { %2187 = vmatprep.subr.bf16.mxu0 %v2716_v29 }
  0xa0   :  { %v71_v17 = vld [vmem:[#allocation2] ss:$8 sm:$0x3]  ;;  %v311_v47 = vld [vmem:[#allocation2 + $0x1] ss:$8 sm:$0x3] }
  0xa1   :  { %80 = vrot.lane.b32.xlu0 %v71_v17, %s2649_s0  ;;  %v1793_v18 = vmul.f32 -1.442695, %v71_v17  ;;  %v138_v17 = vld [vmem:[#allocation3 + $0x118] sm:$0xff] }
  0xa3   :  { %2468 = vpow2.f32 %v1793_v18 }
  0xad   :  { %v2469_v19 = vpop.eup %2468 }
  0xae   :  { %v76_v20 = vadd.f32 1.0, %v2469_v19  ;;  %v2773_v19 = vpack.c.bf16 %v138_v17, %v135_v14 }
  0xb0   :  { %2470 = vrcp.f32 %v76_v20  ;;  %2185 = vmatpush3.bf16.msra.mxu1 %v2773_v19 }
  0xb1   :  { %2210 = vmatprep.subr.bf16.mxu1 %v2650_v30 }
  0xba   :  { %v2712_v23 = vpop.eup %2470 }
  0xbb   :  { %v85_v15 = vmul.f32 0.0, %v2712_v23 }
 0x113   :  { %v81_v21 = vpop.permute.xlu0 %80 }
 0x114   :  { %v82_v22 = vrot.slane %v81_v21, 1  ;;  %v2651_v21 = vmov 0.0  }
 0x115   :  { %207 = vmatprep.mubr.f32.mxu0 %v2651_v21  ;;  %1952 = vmatprep.mubr.msk.f32.mxu1 %vm2652_vm0, %v2651_v21 }
 0x116   :  { %2472 = vtanh.f32 %v82_v22 }
 0x120   :  { %v2473_v24 = vpop.eup %2472 }
 0x121   :  { %v86_v25 = vmul.f32 %v2473_v24, %v2712_v23  ;;  %v94_v24 = vrot.slane %v2712_v23, 1  ;;  %v2653_v23 = vmov 1966171168  }
 0x122   :  { %v316_v28 = vunpack.c.l.s4 %v2653_v23 }
 0x123   :  { %88 = vrot.lane.b32.xlu1 %v86_v25, %s2649_s0 }
 0x124   :  { %v317_v31 = vunpack.c.0.s8 %v316_v28 }
 0x126   :  { %v2823_v33 = vsub.s32 %v317_v31, %v2701_v3 }
 0x195   :  { %v89_v18 = vpop.permute.xlu1 %88 }
 0x196   :  { %v2775_v20 = vadd.f32 %v89_v18, %v85_v15 }
 0x198   :  { %2474 = vtanh.f32 %v2775_v20 }
 0x1a2   :  { %v2475_v22 = vpop.eup %2474 }
 0x1a3   :  { %97 = vrot.lane.b32.xlu1 %v2475_v22, %s2649_s0 }
 0x215   :  { %v98_v25 = vpop.permute.xlu1 %97 }
 0x216   :  { %v100_v26 = vmul.f32 %v98_v25, %v94_v24 }
 0x218   :  { %v102_v27 = vsel %vm101_vm1, %v100_v26, 0.0 }
 0x219   :  { %1794 = vmatmul.mubr.msk.f32.vlgmr.msra.gmra.mrb[0].mxu0 %vm139_vm2, %v102_v27  ;;  %1953 = vmatmul.mubr.msk.f32.vlgmr.msra.gmra.mrb[0].mxu1 %vm139_vm2, %v102_v27 }
 0x21a   :  { %2189 = vmatpush1.bf16.msra.mxu0 %v2719_v34  ;;  %2212 = vmatpush3.bf16.msra.mxu1 %v2721_v35 }
 0x21b   :  { %2191 = vmatprep.subr.bf16.mxu0 %v2724_v39  ;;  %2213 = vmatprep.subr.bf16.mxu1 %v2650_v30 }
 0x21c   :  { %427 = vmatprep.mubr.f32.mxu0 %v2651_v21  ;;  %1979 = vmatprep.mubr.msk.f32.mxu1 %vm2652_vm0, %v2651_v21 }
 0x21e   :  { %2193 = vmatpush1.bf16.msra.mxu0 %v2728_v43  ;;  %2215 = vmatpush3.bf16.msra.mxu1 %v2730_v44 }
 0x21f   :  { %2195 = vmatprep.subr.bf16.mxu0 %v2734_v48  ;;  %2216 = vmatprep.subr.bf16.mxu1 %v2650_v30 }
 0x222   :  { %2197 = vmatpush1.bf16.msra.mxu0 %v2738_v54  ;;  %2218 = vmatpush3.bf16.msra.mxu1 %v2740_v55 }
 0x223   :  { %2199 = vmatprep.subr.bf16.mxu0 %v2744_v57  ;;  %2219 = vmatprep.subr.bf16.mxu1 %v2650_v30 }
 0x226   :  { %2201 = vmatpush1.bf16.msra.mxu0 %v2748_v63  ;;  %2221 = vmatpush3.bf16.msra.mxu1 %v2750_v0 }
 0x227   :  { %2203 = vmatprep.subr.bf16.mxu0 %v2754_v2  ;;  %2222 = vmatprep.subr.bf16.mxu1 %v2650_v30 }
 0x22a   :  { %2205 = vmatpush1.bf16.msra.mxu0 %v2758_v9  ;;  %2224 = vmatpush3.bf16.msra.mxu1 %v2760_v10 }
 0x22b   :  { %2207 = vmatprep.subr.bf16.mxu0 %v2764_v11  ;;  %2225 = vmatprep.subr.bf16.mxu1 %v2650_v30 }
 0x22e   :  { %2209 = vmatpush1.bf16.msra.mxu0 %v2771_v16  ;;  %2227 = vmatpush3.bf16.msra.mxu1 %v2773_v19 }
 0x22f   :  { %2229 = vmatprep.subr.bf16.mxu0 %v2716_v29  ;;  %2252 = vmatprep.subr.bf16.mxu1 %v2650_v30 }
 0x2ec   :  { %v209_v36 = vpop.f32.mrb[0].mxu0  ;;  %v280_v37 = vpop.f32.mrb[0].mxu1 }
 0x2ed   :  { %v285_v38 = vadd.f32 %v2820_v32, %v280_v37  ;;  %v211_v40 = vpop.f32.mrb[1].mxu0  ;;  %v1954_v41 = vpop.f32.mrb[1].mxu1 }
 0x2ee   :  { %v314_v42 = vcombine.low %v209_v36, %v211_v40 }
 0x2ef   :  { %2476 = vtanh.f32 %v285_v38  ;;  %v1796_v3 = vmul.f32 -1.442695, %v285_v38 }
 0x2f0   :  { %v321_v45 = vrot.slane %v314_v42, %v2823_v33  ;;  %v530_v42 = vld [vmem:[#allocation2 + $0x2] ss:$8 sm:$0x3] }
 0x2f1   :  { %2478 = vpow2.f32 %v1796_v3 }
 0x2f2   :  { %v328_v46 = vrot.slane %v321_v45, %v2823_v33 }
 0x2f4   :  { %v330_v49 = vadd.f32 %v328_v46, %v311_v47 }
 0x2f6   :  { %338 = vrot.lane.b32.xlu0 %v330_v49, %s2649_s0  ;;  %v1797_v51 = vmul.f32 -1.442695, %v330_v49 }
 0x2f8   :  { %2480 = vpow2.f32 %v1797_v51 }
 0x2f9   :  { %v2477_v50 = vpop.eup %2476 }
 0x2fa   :  { %295 = vrot.lane.b32.xlu1 %v2477_v50, %s2654_s12 }
 0x2fb   :  { %v2479_v52 = vpop.eup %2478 }
 0x2fc   :  { %v289_v53 = vadd.f32 1.0, %v2479_v52 }
 0x2fe   :  { %2482 = vrcp.f32 %v289_v53 }
 0x302   :  { %v2481_v56 = vpop.eup %2480 }
 0x303   :  { %v334_v58 = vadd.f32 1.0, %v2481_v56 }
 0x305   :  { %2484 = vrcp.f32 %v334_v58 }
 0x308   :  { %v2483_v61 = vpop.eup %2482 }
 0x309   :  { %v293_v7 = vmul.f32 0.0, %v2483_v61 }
 0x30f   :  { %v2485_v4 = vpop.eup %2484 }
 0x310   :  { %v343_v13 = vmul.f32 %v2485_v4, %v2775_v20  ;;  %v352_v24 = vrot.slane %v2485_v4, 1 }
 0x368   :  { %v339_v59 = vpop.permute.xlu0 %338 }
 0x369   :  { %v340_v60 = vrot.slane %v339_v59, 1 }
 0x36b   :  { %2486 = vtanh.f32 %v340_v60 }
 0x36c   :  { %v296_v62 = vpop.permute.xlu1 %295 }
 0x36d   :  { %v298_v1 = vmul.f32 %v2483_v61, %v296_v62 }
 0x36f   :  { %300 = vrot.lane.b32.xlu0 %v298_v1, %s2654_s12 }
 0x375   :  { %v2487_v5 = vpop.eup %2486 }
 0x376   :  { %v344_v6 = vmul.f32 %v2487_v5, %v2485_v4 }
 0x378   :  { %346 = vrot.lane.b32.xlu1 %v344_v6, %s2649_s0 }
 0x3e1   :  { %v301_v8 = vpop.permute.xlu0 %300 }
 0x3e2   :  { %v2832_v12 = vadd.f32 %v301_v8, %v293_v7 }
 0x3e4   :  { %2488 = vtanh.f32 %v2832_v12 }
 0x3ea   :  { %v347_v14 = vpop.permute.xlu1 %346 }
 0x3eb   :  { %v2836_v15 = vadd.f32 %v347_v14, %v343_v13 }
 0x3ed   :  { %2490 = vtanh.f32 %v2836_v15 }
 0x3ee   :  { %v2489_v17 = vpop.eup %2488 }
 0x3ef   :  { %306 = vrot.lane.b32.xlu0 %v2489_v17, %s2654_s12 }
 0x3f7   :  { %v2491_v18 = vpop.eup %2490 }
 0x3f8   :  { %355 = vrot.lane.b32.xlu1 %v2491_v18, %s2649_s0 }
 0x461   :  { %v307_v22 = vpop.permute.xlu0 %306 }
 0x462   :  { %v309_v26 = vmul.f32 %v2483_v61, %v307_v22 }
 0x46a   :  { %v356_v25 = vpop.permute.xlu1 %355 }
 0x46b   :  { %v358_v27 = vmul.f32 %v356_v25, %v352_v24 }
 0x46d   :  { %v359_v23 = vsel %vm101_vm1, %v358_v27, %v309_v26 }
 0x46e   :  { %1798 = vmatmul.mubr.msk.f32.vlgmr.msra.gmra.mrb[2].mxu0 %vm139_vm2, %v359_v23  ;;  %1980 = vmatmul.mubr.msk.f32.vlgmr.msra.gmra.mrb[2].mxu1 %vm139_vm2, %v359_v23 }
 0x46f   :  { %2231 = vmatpush1.bf16.msra.mxu0 %v2719_v34  ;;  %2254 = vmatpush3.bf16.msra.mxu1 %v2721_v35 }
 0x470   :  { %2233 = vmatprep.subr.bf16.mxu0 %v2724_v39  ;;  %2255 = vmatprep.subr.bf16.mxu1 %v2650_v30 }
 0x471   :  { %646 = vmatprep.mubr.f32.mxu0 %v2651_v21  ;;  %2006 = vmatprep.mubr.msk.f32.mxu1 %vm2652_vm0, %v2651_v21 }
 0x473   :  { %2235 = vmatpush1.bf16.msra.mxu0 %v2728_v43  ;;  %2257 = vmatpush3.bf16.msra.mxu1 %v2730_v44 }
 0x474   :  { %2237 = vmatprep.subr.bf16.mxu0 %v2734_v48  ;;  %2258 = vmatprep.subr.bf16.mxu1 %v2650_v30 }
 0x477   :  { %2239 = vmatpush1.bf16.msra.mxu0 %v2738_v54  ;;  %2260 = vmatpush3.bf16.msra.mxu1 %v2740_v55 }
 0x478   :  { %2241 = vmatprep.subr.bf16.mxu0 %v2744_v57  ;;  %2261 = vmatprep.subr.bf16.mxu1 %v2650_v30 }
 0x47b   :  { %2243 = vmatpush1.bf16.msra.mxu0 %v2748_v63  ;;  %2263 = vmatpush3.bf16.msra.mxu1 %v2750_v0 }
 0x47c   :  { %2245 = vmatprep.subr.bf16.mxu0 %v2754_v2  ;;  %2264 = vmatprep.subr.bf16.mxu1 %v2650_v30 }
 0x47f   :  { %2247 = vmatpush1.bf16.msra.mxu0 %v2758_v9  ;;  %2266 = vmatpush3.bf16.msra.mxu1 %v2760_v10 }
 0x480   :  { %2249 = vmatprep.subr.bf16.mxu0 %v2764_v11  ;;  %2267 = vmatprep.subr.bf16.mxu1 %v2650_v30 }
 0x483   :  { %2251 = vmatpush1.bf16.msra.mxu0 %v2771_v16  ;;  %2269 = vmatpush3.bf16.msra.mxu1 %v2773_v19 }
 0x484   :  { %2271 = vmatprep.subr.bf16.mxu0 %v2716_v29  ;;  %2294 = vmatprep.subr.bf16.mxu1 %v2650_v30 }
 0x541   :  { %v429_v20 = vpop.f32.mrb[2].mxu0  ;;  %v500_v28 = vpop.f32.mrb[2].mxu1 }
 0x542   :  { %v504_v31 = vadd.f32 %v500_v28, %v2820_v32  ;;  %v431_v36 = vpop.f32.mrb[3].mxu0  ;;  %v1981_v37 = vpop.f32.mrb[3].mxu1 }
 0x543   :  { %v533_v38 = vcombine.low %v429_v20, %v431_v36 }
 0x544   :  { %2492 = vtanh.f32 %v504_v31  ;;  %v1800_v47 = vmul.f32 -1.442695, %v504_v31 }
 0x545   :  { %v540_v40 = vrot.slane %v533_v38, %v2823_v33  ;;  %v749_v38 = vld [vmem:[#allocation2 + $0x3] ss:$8 sm:$0x3] }
 0x546   :  { %2494 = vpow2.f32 %v1800_v47 }
 0x547   :  { %v547_v41 = vrot.slane %v540_v40, %v2823_v33 }
 0x549   :  { %v549_v45 = vadd.f32 %v547_v41, %v530_v42 }
 0x54b   :  { %557 = vrot.lane.b32.xlu0 %v549_v45, %s2649_s0  ;;  %v1801_v49 = vmul.f32 -1.442695, %v549_v45 }
 0x54d   :  { %2496 = vpow2.f32 %v1801_v49 }
 0x54e   :  { %v2493_v46 = vpop.eup %2492 }
 0x54f   :  { %514 = vrot.lane.b32.xlu1 %v2493_v46, %s2654_s12 }
 0x550   :  { %v2495_v50 = vpop.eup %2494 }
 0x551   :  { %v508_v3 = vadd.f32 1.0, %v2495_v50 }
 0x553   :  { %2498 = vrcp.f32 %v508_v3 }
 0x557   :  { %v2497_v51 = vpop.eup %2496 }
 0x558   :  { %v553_v52 = vadd.f32 1.0, %v2497_v51 }
 0x55a   :  { %2500 = vrcp.f32 %v553_v52 }
 0x55d   :  { %v2499_v58 = vpop.eup %2498 }
 0x55e   :  { %v512_v4 = vmul.f32 %v2499_v58, %v2832_v12 }
 0x564   :  { %v2501_v61 = vpop.eup %2500 }
 0x565   :  { %v562_v7 = vmul.f32 %v2501_v61, %v2836_v15  ;;  %v571_v12 = vrot.slane %v2501_v61, 1 }
 0x5bd   :  { %v558_v53 = vpop.permute.xlu0 %557 }
 0x5be   :  { %v559_v56 = vrot.slane %v558_v53, 1 }
 0x5c0   :  { %2502 = vtanh.f32 %v559_v56 }
 0x5c1   :  { %v515_v59 = vpop.permute.xlu1 %514 }
 0x5c2   :  { %v517_v60 = vmul.f32 %v2499_v58, %v515_v59 }
 0x5c4   :  { %519 = vrot.lane.b32.xlu0 %v517_v60, %s2654_s12 }
 0x5ca   :  { %v2503_v62 = vpop.eup %2502 }
 0x5cb   :  { %v563_v1 = vmul.f32 %v2503_v62, %v2501_v61 }
 0x5cd   :  { %565 = vrot.lane.b32.xlu1 %v563_v1, %s2649_s0 }
 0x636   :  { %v520_v5 = vpop.permute.xlu0 %519 }
 0x637   :  { %v2879_v6 = vadd.f32 %v520_v5, %v512_v4 }
 0x639   :  { %2504 = vtanh.f32 %v2879_v6 }
 0x63f   :  { %v566_v8 = vpop.permute.xlu1 %565 }
 0x640   :  { %v2883_v13 = vadd.f32 %v566_v8, %v562_v7 }
 0x642   :  { %2506 = vtanh.f32 %v2883_v13 }
 0x643   :  { %v2505_v14 = vpop.eup %2504 }
 0x644   :  { %525 = vrot.lane.b32.xlu0 %v2505_v14, %s2654_s12 }
 0x64c   :  { %v2507_v17 = vpop.eup %2506 }
 0x64d   :  { %574 = vrot.lane.b32.xlu1 %v2507_v17, %s2649_s0 }
 0x6b6   :  { %v526_v18 = vpop.permute.xlu0 %525 }
 0x6b7   :  { %v528_v24 = vmul.f32 %v2499_v58, %v526_v18 }
 0x6bf   :  { %v575_v22 = vpop.permute.xlu1 %574 }
 0x6c0   :  { %v577_v25 = vmul.f32 %v575_v22, %v571_v12 }
 0x6c2   :  { %v578_v26 = vsel %vm101_vm1, %v577_v25, %v528_v24 }
 0x6c3   :  { %1802 = vmatmul.mubr.msk.f32.vlgmr.msra.gmra.mrb[4].mxu0 %vm139_vm2, %v578_v26  ;;  %2007 = vmatmul.mubr.msk.f32.vlgmr.msra.gmra.mrb[4].mxu1 %vm139_vm2, %v578_v26 }
 0x6c4   :  { %2273 = vmatpush1.bf16.msra.mxu0 %v2719_v34  ;;  %2296 = vmatpush3.bf16.msra.mxu1 %v2721_v35 }
 0x6c5   :  { %2275 = vmatprep.subr.bf16.mxu0 %v2724_v39  ;;  %2297 = vmatprep.subr.bf16.mxu1 %v2650_v30 }
 0x6c6   :  { %865 = vmatprep.mubr.f32.mxu0 %v2651_v21  ;;  %2033 = vmatprep.mubr.msk.f32.mxu1 %vm2652_vm0, %v2651_v21 }
 0x6c8   :  { %2277 = vmatpush1.bf16.msra.mxu0 %v2728_v43  ;;  %2299 = vmatpush3.bf16.msra.mxu1 %v2730_v44 }
 0x6c9   :  { %2279 = vmatprep.subr.bf16.mxu0 %v2734_v48  ;;  %2300 = vmatprep.subr.bf16.mxu1 %v2650_v30 }
 0x6cc   :  { %2281 = vmatpush1.bf16.msra.mxu0 %v2738_v54  ;;  %2302 = vmatpush3.bf16.msra.mxu1 %v2740_v55 }
 0x6cd   :  { %2283 = vmatprep.subr.bf16.mxu0 %v2744_v57  ;;  %2303 = vmatprep.subr.bf16.mxu1 %v2650_v30 }
 0x6d0   :  { %2285 = vmatpush1.bf16.msra.mxu0 %v2748_v63  ;;  %2305 = vmatpush3.bf16.msra.mxu1 %v2750_v0 }
 0x6d1   :  { %2287 = vmatprep.subr.bf16.mxu0 %v2754_v2  ;;  %2306 = vmatprep.subr.bf16.mxu1 %v2650_v30 }
 0x6d4   :  { %2289 = vmatpush1.bf16.msra.mxu0 %v2758_v9  ;;  %2308 = vmatpush3.bf16.msra.mxu1 %v2760_v10 }
 0x6d5   :  { %2291 = vmatprep.subr.bf16.mxu0 %v2764_v11  ;;  %2309 = vmatprep.subr.bf16.mxu1 %v2650_v30 }
 0x6d8   :  { %2293 = vmatpush1.bf16.msra.mxu0 %v2771_v16  ;;  %2311 = vmatpush3.bf16.msra.mxu1 %v2773_v19 }
 0x6d9   :  { %2313 = vmatprep.subr.bf16.mxu0 %v2716_v29  ;;  %2336 = vmatprep.subr.bf16.mxu1 %v2650_v30 }
 0x796   :  { %v648_v15 = vpop.f32.mrb[4].mxu0  ;;  %v719_v27 = vpop.f32.mrb[4].mxu1 }
 0x797   :  { %v723_v23 = vadd.f32 %v719_v27, %v2820_v32  ;;  %v650_v20 = vpop.f32.mrb[5].mxu0  ;;  %v2008_v28 = vpop.f32.mrb[5].mxu1 }
 0x798   :  { %v752_v31 = vcombine.low %v648_v15, %v650_v20 }
 0x799   :  { %2508 = vtanh.f32 %v723_v23  ;;  %v1804_v42 = vmul.f32 -1.442695, %v723_v23 }
 0x79a   :  { %v759_v36 = vrot.slane %v752_v31, %v2823_v33  ;;  %v968_v31 = vld [vmem:[#allocation2 + $0x4] ss:$8 sm:$0x3] }
 0x79b   :  { %2510 = vpow2.f32 %v1804_v42 }
 0x79c   :  { %v766_v37 = vrot.slane %v759_v36, %v2823_v33 }
 0x79e   :  { %v768_v40 = vadd.f32 %v766_v37, %v749_v38 }
 0x7a0   :  { %776 = vrot.lane.b32.xlu0 %v768_v40, %s2649_s0  ;;  %v1805_v45 = vmul.f32 -1.442695, %v768_v40 }
 0x7a2   :  { %2512 = vpow2.f32 %v1805_v45 }
 0x7a3   :  { %v2509_v41 = vpop.eup %2508 }
 0x7a4   :  { %733 = vrot.lane.b32.xlu1 %v2509_v41, %s2654_s12 }
 0x7a5   :  { %v2511_v46 = vpop.eup %2510 }
 0x7a6   :  { %v727_v47 = vadd.f32 1.0, %v2511_v46 }
 0x7a8   :  { %2514 = vrcp.f32 %v727_v47 }
 0x7ac   :  { %v2513_v49 = vpop.eup %2512 }
 0x7ad   :  { %v772_v50 = vadd.f32 1.0, %v2513_v49 }
 0x7af   :  { %2516 = vrcp.f32 %v772_v50 }
 0x7b2   :  { %v2515_v52 = vpop.eup %2514 }
 0x7b3   :  { %v731_v61 = vmul.f32 %v2515_v52, %v2879_v6 }
 0x7b9   :  { %v2517_v58 = vpop.eup %2516 }
 0x7ba   :  { %v781_v4 = vmul.f32 %v2517_v58, %v2883_v13  ;;  %v790_v6 = vrot.slane %v2517_v58, 1 }
 0x812   :  { %v777_v3 = vpop.permute.xlu0 %776 }
 0x813   :  { %v778_v51 = vrot.slane %v777_v3, 1 }
 0x815   :  { %2518 = vtanh.f32 %v778_v51 }
 0x816   :  { %v734_v53 = vpop.permute.xlu1 %733 }
 0x817   :  { %v736_v56 = vmul.f32 %v2515_v52, %v734_v53 }
 0x819   :  { %738 = vrot.lane.b32.xlu0 %v736_v56, %s2654_s12 }
 0x81f   :  { %v2519_v59 = vpop.eup %2518 }
 0x820   :  { %v782_v60 = vmul.f32 %v2519_v59, %v2517_v58 }
 0x822   :  { %784 = vrot.lane.b32.xlu1 %v782_v60, %s2649_s0 }
 0x88b   :  { %v739_v62 = vpop.permute.xlu0 %738 }
 0x88c   :  { %v2926_v1 = vadd.f32 %v739_v62, %v731_v61 }
 0x88e   :  { %2520 = vtanh.f32 %v2926_v1 }
 0x894   :  { %v785_v5 = vpop.permute.xlu1 %784 }
 0x895   :  { %v2930_v7 = vadd.f32 %v785_v5, %v781_v4 }
 0x897   :  { %2522 = vtanh.f32 %v2930_v7 }
 0x898   :  { %v2521_v8 = vpop.eup %2520 }
 0x899   :  { %744 = vrot.lane.b32.xlu0 %v2521_v8, %s2654_s12 }
 0x8a1   :  { %v2523_v14 = vpop.eup %2522 }
 0x8a2   :  { %793 = vrot.lane.b32.xlu1 %v2523_v14, %s2649_s0 }
 0x90b   :  { %v745_v17 = vpop.permute.xlu0 %744 }
 0x90c   :  { %v747_v12 = vmul.f32 %v2515_v52, %v745_v17 }
 0x914   :  { %v794_v18 = vpop.permute.xlu1 %793 }
 0x915   :  { %v796_v22 = vmul.f32 %v794_v18, %v790_v6 }
 0x917   :  { %v797_v24 = vsel %vm101_vm1, %v796_v22, %v747_v12 }
 0x918   :  { %1806 = vmatmul.mubr.msk.f32.vlgmr.msra.gmra.mrb[6].mxu0 %vm139_vm2, %v797_v24  ;;  %2034 = vmatmul.mubr.msk.f32.vlgmr.msra.gmra.mrb[6].mxu1 %vm139_vm2, %v797_v24 }
 0x919   :  { %2315 = vmatpush1.bf16.msra.mxu0 %v2719_v34  ;;  %2338 = vmatpush3.bf16.msra.mxu1 %v2721_v35 }
 0x91a   :  { %2317 = vmatprep.subr.bf16.mxu0 %v2724_v39  ;;  %2339 = vmatprep.subr.bf16.mxu1 %v2650_v30 }
 0x91b   :  { %1084 = vmatprep.mubr.f32.mxu0 %v2651_v21  ;;  %2060 = vmatprep.mubr.msk.f32.mxu1 %vm2652_vm0, %v2651_v21 }
 0x91d   :  { %2319 = vmatpush1.bf16.msra.mxu0 %v2728_v43  ;;  %2341 = vmatpush3.bf16.msra.mxu1 %v2730_v44 }
 0x91e   :  { %2321 = vmatprep.subr.bf16.mxu0 %v2734_v48  ;;  %2342 = vmatprep.subr.bf16.mxu1 %v2650_v30 }
 0x921   :  { %2323 = vmatpush1.bf16.msra.mxu0 %v2738_v54  ;;  %2344 = vmatpush3.bf16.msra.mxu1 %v2740_v55 }
 0x922   :  { %2325 = vmatprep.subr.bf16.mxu0 %v2744_v57  ;;  %2345 = vmatprep.subr.bf16.mxu1 %v2650_v30 }
 0x925   :  { %2327 = vmatpush1.bf16.msra.mxu0 %v2748_v63  ;;  %2347 = vmatpush3.bf16.msra.mxu1 %v2750_v0 }
 0x926   :  { %2329 = vmatprep.subr.bf16.mxu0 %v2754_v2  ;;  %2348 = vmatprep.subr.bf16.mxu1 %v2650_v30 }
 0x929   :  { %2331 = vmatpush1.bf16.msra.mxu0 %v2758_v9  ;;  %2350 = vmatpush3.bf16.msra.mxu1 %v2760_v10 }
 0x92a   :  { %2333 = vmatprep.subr.bf16.mxu0 %v2764_v11  ;;  %2351 = vmatprep.subr.bf16.mxu1 %v2650_v30 }
 0x92d   :  { %2335 = vmatpush1.bf16.msra.mxu0 %v2771_v16  ;;  %2353 = vmatpush3.bf16.msra.mxu1 %v2773_v19 }
 0x92e   :  { %2355 = vmatprep.subr.bf16.mxu0 %v2716_v29  ;;  %2378 = vmatprep.subr.bf16.mxu1 %v2650_v30 }
 0x9eb   :  { %v867_v13 = vpop.f32.mrb[6].mxu0  ;;  %v938_v25 = vpop.f32.mrb[6].mxu1 }
 0x9ec   :  { %v942_v26 = vadd.f32 %v938_v25, %v2820_v32  ;;  %v869_v15 = vpop.f32.mrb[7].mxu0  ;;  %v2035_v27 = vpop.f32.mrb[7].mxu1 }
 0x9ed   :  { %v971_v23 = vcombine.low %v867_v13, %v869_v15 }
 0x9ee   :  { %2524 = vtanh.f32 %v942_v26  ;;  %v1808_v38 = vmul.f32 -1.442695, %v942_v26 }
 0x9ef   :  { %v978_v20 = vrot.slane %v971_v23, %v2823_v33  ;;  %v1187_v23 = vld [vmem:[#allocation2 + $0x5] ss:$8 sm:$0x3] }
 0x9f0   :  { %2526 = vpow2.f32 %v1808_v38 }
 0x9f1   :  { %v985_v28 = vrot.slane %v978_v20, %v2823_v33 }
 0x9f3   :  { %v987_v36 = vadd.f32 %v985_v28, %v968_v31 }
 0x9f5   :  { %995 = vrot.lane.b32.xlu0 %v987_v36, %s2649_s0  ;;  %v1809_v40 = vmul.f32 -1.442695, %v987_v36 }
 0x9f7   :  { %2528 = vpow2.f32 %v1809_v40 }
 0x9f8   :  { %v2525_v37 = vpop.eup %2524 }
 0x9f9   :  { %952 = vrot.lane.b32.xlu1 %v2525_v37, %s2654_s12 }
 0x9fa   :  { %v2527_v41 = vpop.eup %2526 }
 0x9fb   :  { %v946_v42 = vadd.f32 1.0, %v2527_v41 }
 0x9fd   :  { %2530 = vrcp.f32 %v946_v42 }
 0xa01   :  { %v2529_v45 = vpop.eup %2528 }
 0xa02   :  { %v991_v46 = vadd.f32 1.0, %v2529_v45 }
 0xa04   :  { %2532 = vrcp.f32 %v991_v46 }
 0xa07   :  { %v2531_v50 = vpop.eup %2530 }
 0xa08   :  { %v950_v58 = vmul.f32 %v2531_v50, %v2926_v1 }
 0xa0e   :  { %v2533_v52 = vpop.eup %2532 }
 0xa0f   :  { %v1000_v61 = vmul.f32 %v2533_v52, %v2930_v7  ;;  %v1009_v1 = vrot.slane %v2533_v52, 1 }
 0xa67   :  { %v996_v47 = vpop.permute.xlu0 %995 }
 0xa68   :  { %v997_v49 = vrot.slane %v996_v47, 1 }
 0xa6a   :  { %2534 = vtanh.f32 %v997_v49 }
 0xa6b   :  { %v953_v3 = vpop.permute.xlu1 %952 }
 0xa6c   :  { %v955_v51 = vmul.f32 %v2531_v50, %v953_v3 }
 0xa6e   :  { %957 = vrot.lane.b32.xlu0 %v955_v51, %s2654_s12 }
 0xa74   :  { %v2535_v53 = vpop.eup %2534 }
 0xa75   :  { %v1001_v56 = vmul.f32 %v2535_v53, %v2533_v52 }
 0xa77   :  { %1003 = vrot.lane.b32.xlu1 %v1001_v56, %s2649_s0 }
 0xae0   :  { %v958_v59 = vpop.permute.xlu0 %957 }
 0xae1   :  { %v2973_v60 = vadd.f32 %v958_v59, %v950_v58 }
 0xae3   :  { %2536 = vtanh.f32 %v2973_v60 }
 0xae9   :  { %v1004_v62 = vpop.permute.xlu1 %1003 }
 0xaea   :  { %v2977_v4 = vadd.f32 %v1004_v62, %v1000_v61 }
 0xaec   :  { %2538 = vtanh.f32 %v2977_v4 }
 0xaed   :  { %v2537_v5 = vpop.eup %2536 }
 0xaee   :  { %963 = vrot.lane.b32.xlu0 %v2537_v5, %s2654_s12 }
 0xaf6   :  { %v2539_v8 = vpop.eup %2538 }
 0xaf7   :  { %1012 = vrot.lane.b32.xlu1 %v2539_v8, %s2649_s0 }
 0xb60   :  { %v964_v14 = vpop.permute.xlu0 %963 }
 0xb61   :  { %v966_v6 = vmul.f32 %v2531_v50, %v964_v14 }
 0xb69   :  { %v1013_v17 = vpop.permute.xlu1 %1012 }
 0xb6a   :  { %v1015_v18 = vmul.f32 %v1013_v17, %v1009_v1 }
 0xb6c   :  { %v1016_v12 = vsel %vm101_vm1, %v1015_v18, %v966_v6 }
 0xb6d   :  { %1810 = vmatmul.mubr.msk.f32.vlgmr.msra.gmra.mrb[8].mxu0 %vm139_vm2, %v1016_v12  ;;  %2061 = vmatmul.mubr.msk.f32.vlgmr.msra.gmra.mrb[8].mxu1 %vm139_vm2, %v1016_v12 }
 0xb6e   :  { %2357 = vmatpush1.bf16.msra.mxu0 %v2719_v34  ;;  %2380 = vmatpush3.bf16.msra.mxu1 %v2721_v35 }
 0xb6f   :  { %2359 = vmatprep.subr.bf16.mxu0 %v2724_v39  ;;  %2381 = vmatprep.subr.bf16.mxu1 %v2650_v30 }
 0xb70   :  { %1303 = vmatprep.mubr.f32.mxu0 %v2651_v21  ;;  %2087 = vmatprep.mubr.msk.f32.mxu1 %vm2652_vm0, %v2651_v21 }
 0xb72   :  { %2361 = vmatpush1.bf16.msra.mxu0 %v2728_v43  ;;  %2383 = vmatpush3.bf16.msra.mxu1 %v2730_v44 }
 0xb73   :  { %2363 = vmatprep.subr.bf16.mxu0 %v2734_v48  ;;  %2384 = vmatprep.subr.bf16.mxu1 %v2650_v30 }
 0xb76   :  { %2365 = vmatpush1.bf16.msra.mxu0 %v2738_v54  ;;  %2386 = vmatpush3.bf16.msra.mxu1 %v2740_v55 }
 0xb77   :  { %2367 = vmatprep.subr.bf16.mxu0 %v2744_v57  ;;  %2387 = vmatprep.subr.bf16.mxu1 %v2650_v30 }
 0xb7a   :  { %2369 = vmatpush1.bf16.msra.mxu0 %v2748_v63  ;;  %2389 = vmatpush3.bf16.msra.mxu1 %v2750_v0 }
 0xb7b   :  { %2371 = vmatprep.subr.bf16.mxu0 %v2754_v2  ;;  %2390 = vmatprep.subr.bf16.mxu1 %v2650_v30 }
 0xb7e   :  { %2373 = vmatpush1.bf16.msra.mxu0 %v2758_v9  ;;  %2392 = vmatpush3.bf16.msra.mxu1 %v2760_v10 }
 0xb7f   :  { %2375 = vmatprep.subr.bf16.mxu0 %v2764_v11  ;;  %2393 = vmatprep.subr.bf16.mxu1 %v2650_v30 }
 0xb82   :  { %2377 = vmatpush1.bf16.msra.mxu0 %v2771_v16  ;;  %2395 = vmatpush3.bf16.msra.mxu1 %v2773_v19 }
 0xb83   :  { %2397 = vmatprep.subr.bf16.mxu0 %v2716_v29  ;;  %2420 = vmatprep.subr.bf16.mxu1 %v2650_v30 }
 0xc40   :  { %v1086_v7 = vpop.f32.mrb[8].mxu0  ;;  %v1157_v22 = vpop.f32.mrb[8].mxu1 }
 0xc41   :  { %v1161_v24 = vadd.f32 %v1157_v22, %v2820_v32  ;;  %v1088_v13 = vpop.f32.mrb[9].mxu0  ;;  %v2062_v25 = vpop.f32.mrb[9].mxu1 }
 0xc42   :  { %v1190_v26 = vcombine.low %v1086_v7, %v1088_v13 }
 0xc43   :  { %2540 = vtanh.f32 %v1161_v24  ;;  %v1812_v29 = vmul.f32 -1.442695, %v1161_v24 }
 0xc44   :  { %v1197_v15 = vrot.slane %v1190_v26, %v2823_v33 }
 0xc45   :  { %2542 = vpow2.f32 %v1812_v29 }
 0xc46   :  { %v1204_v27 = vrot.slane %v1197_v15, %v2823_v33 }
 0xc48   :  { %v1206_v20 = vadd.f32 %v1204_v27, %v1187_v23 }
 0xc4a   :  { %1214 = vrot.lane.b32.xlu0 %v1206_v20, %s2649_s0  ;;  %v1813_v31 = vmul.f32 -1.442695, %v1206_v20 }
 0xc4c   :  { %2544 = vpow2.f32 %v1813_v31 }
 0xc4d   :  { %v2541_v28 = vpop.eup %2540 }
 0xc4e   :  { %1171 = vrot.lane.b32.xlu1 %v2541_v28, %s2654_s12 }
 0xc4f   :  { %v2543_v36 = vpop.eup %2542 }
 0xc50   :  { %v1165_v37 = vadd.f32 1.0, %v2543_v36 }
 0xc52   :  { %2546 = vrcp.f32 %v1165_v37 }
 0xc56   :  { %v2545_v38 = vpop.eup %2544 }
 0xc57   :  { %v1210_v40 = vadd.f32 1.0, %v2545_v38 }
 0xc59   :  { %2548 = vrcp.f32 %v1210_v40 }
 0xc5c   :  { %v2547_v45 = vpop.eup %2546 }
 0xc5d   :  { %v1169_v51 = vmul.f32 %v2547_v45, %v2973_v60 }
 0xc63   :  { %v2549_v49 = vpop.eup %2548 }
 0xc64   :  { %v1219_v56 = vmul.f32 %v2549_v49, %v2977_v4  ;;  %v1228_v60 = vrot.slane %v2549_v49, 1 }
 0xcbc   :  { %v1215_v41 = vpop.permute.xlu0 %1214 }
 0xcbd   :  { %v1216_v42 = vrot.slane %v1215_v41, 1 }
 0xcbf   :  { %2550 = vtanh.f32 %v1216_v42 }
 0xcc0   :  { %v1172_v46 = vpop.permute.xlu1 %1171 }
 0xcc1   :  { %v1174_v47 = vmul.f32 %v2547_v45, %v1172_v46 }
 0xcc3   :  { %1176 = vrot.lane.b32.xlu0 %v1174_v47, %s2654_s12 }
 0xcc9   :  { %v2551_v50 = vpop.eup %2550 }
 0xcca   :  { %v1220_v3 = vmul.f32 %v2551_v50, %v2549_v49 }
 0xccc   :  { %1222 = vrot.lane.b32.xlu1 %v1220_v3, %s2649_s0 }
 0xd35   :  { %v1177_v52 = vpop.permute.xlu0 %1176 }
 0xd36   :  { %v3020_v53 = vadd.f32 %v1177_v52, %v1169_v51 }
 0xd38   :  { %2552 = vtanh.f32 %v3020_v53 }
 0xd3e   :  { %v1223_v58 = vpop.permute.xlu1 %1222 }
 0xd3f   :  { %v3024_v59 = vadd.f32 %v1223_v58, %v1219_v56 }
 0xd41   :  { %2554 = vtanh.f32 %v3024_v59 }
 0xd42   :  { %v2553_v61 = vpop.eup %2552 }
 0xd43   :  { %1182 = vrot.lane.b32.xlu0 %v2553_v61, %s2654_s12 }
 0xd4b   :  { %v2555_v62 = vpop.eup %2554 }
 0xd4c   :  { %1231 = vrot.lane.b32.xlu1 %v2555_v62, %s2649_s0 }
 0xdb5   :  { %v1183_v5 = vpop.permute.xlu0 %1182 }
 0xdb6   :  { %v1185_v14 = vmul.f32 %v2547_v45, %v1183_v5 }
 0xdbe   :  { %v1232_v8 = vpop.permute.xlu1 %1231 }
 0xdbf   :  { %v1234_v1 = vmul.f32 %v1232_v8, %v1228_v60 }
 0xdc1   :  { %v1235_v17 = vsel %vm101_vm1, %v1234_v1, %v1185_v14 }
 0xdc2   :  { %1814 = vmatmul.mubr.msk.f32.vlgmr.msra.gmra.mrb[10].mxu0 %vm139_vm2, %v1235_v17  ;;  %2088 = vmatmul.mubr.msk.f32.vlgmr.msra.gmra.mrb[10].mxu1 %vm139_vm2, %v1235_v17 }
 0xdc3   :  { %2399 = vmatpush1.bf16.msra.mxu0 %v2719_v34  ;;  %2422 = vmatpush3.bf16.msra.mxu1 %v2721_v35 }
 0xdc4   :  { %2401 = vmatprep.subr.bf16.mxu0 %v2724_v39  ;;  %2423 = vmatprep.subr.bf16.mxu1 %v2650_v30 }
 0xdc5   :  { %1522 = vmatprep.mubr.f32.mxu0 %v2651_v21  ;;  %2114 = vmatprep.mubr.msk.f32.mxu1 %vm2652_vm0, %v2651_v21 }
 0xdc7   :  { %2403 = vmatpush1.bf16.msra.mxu0 %v2728_v43  ;;  %2425 = vmatpush3.bf16.msra.mxu1 %v2730_v44 }
 0xdc8   :  { %2405 = vmatprep.subr.bf16.mxu0 %v2734_v48  ;;  %2426 = vmatprep.subr.bf16.mxu1 %v2650_v30 }
 0xdcb   :  { %2407 = vmatpush1.bf16.msra.mxu0 %v2738_v54  ;;  %2428 = vmatpush3.bf16.msra.mxu1 %v2740_v55 }
 0xdcc   :  { %2409 = vmatprep.subr.bf16.mxu0 %v2744_v57  ;;  %2429 = vmatprep.subr.bf16.mxu1 %v2650_v30 }
 0xdcf   :  { %2411 = vmatpush1.bf16.msra.mxu0 %v2748_v63  ;;  %2431 = vmatpush3.bf16.msra.mxu1 %v2750_v0 }
 0xdd0   :  { %2413 = vmatprep.subr.bf16.mxu0 %v2754_v2  ;;  %2432 = vmatprep.subr.bf16.mxu1 %v2650_v30 }
 0xdd3   :  { %2415 = vmatpush1.bf16.msra.mxu0 %v2758_v9  ;;  %2434 = vmatpush3.bf16.msra.mxu1 %v2760_v10  ;;  %v1406_v9 = vld [vmem:[#allocation2 + $0x6] ss:$8 sm:$0x3] }
 0xdd4   :  { %2417 = vmatprep.subr.bf16.mxu0 %v2764_v11  ;;  %2435 = vmatprep.subr.bf16.mxu1 %v2650_v30 }
 0xdd7   :  { %2419 = vmatpush1.bf16.msra.mxu0 %v2771_v16  ;;  %2437 = vmatpush3.bf16.msra.mxu1 %v2773_v19 }
 0xdd8   :  { %2438 = vmatprep.subr.bf16.mxu0 %v2650_v30 }
 0xe95   :  { %v1305_v34 = vpop.f32.mrb[10].mxu0  ;;  %v1376_v39 = vpop.f32.mrb[10].mxu1 }
 0xe96   :  { %v1380_v43 = vadd.f32 %v1376_v39, %v2820_v32  ;;  %v1307_v48 = vpop.f32.mrb[11].mxu0  ;;  %v2089_v54 = vpop.f32.mrb[11].mxu1 }
 0xe97   :  { %v1409_v57 = vcombine.low %v1305_v34, %v1307_v48 }
 0xe98   :  { %2556 = vtanh.f32 %v1380_v43  ;;  %v1816_v4 = vmul.f32 -1.442695, %v1380_v43 }
 0xe99   :  { %v1416_v63 = vrot.slane %v1409_v57, %v2823_v33 }
 0xe9a   :  { %2558 = vpow2.f32 %v1816_v4 }
 0xe9b   :  { %v1423_v2 = vrot.slane %v1416_v63, %v2823_v33 }
 0xe9d   :  { %v1425_v11 = vadd.f32 %v1423_v2, %v1406_v9 }
 0xe9f   :  { %1433 = vrot.lane.b32.xlu0 %v1425_v11, %s2649_s0  ;;  %v1817_v6 = vmul.f32 -1.442695, %v1425_v11 }
 0xea1   :  { %2560 = vpow2.f32 %v1817_v6 }
 0xea2   :  { %v2557_v16 = vpop.eup %2556 }
 0xea3   :  { %1390 = vrot.lane.b32.xlu1 %v2557_v16, %s2654_s12 }
 0xea4   :  { %v2559_v18 = vpop.eup %2558 }
 0xea5   :  { %v1384_v12 = vadd.f32 1.0, %v2559_v18 }
 0xea7   :  { %2562 = vrcp.f32 %v1384_v12 }
 0xeab   :  { %v2561_v7 = vpop.eup %2560 }
 0xeac   :  { %v1429_v22 = vadd.f32 1.0, %v2561_v7  ;;  %v2596_v7 = vld [vmem:[%s3127_s4] sm:$0x1]  ;;  %s2655_s4 = smov [#allocation6]  }
 0xead   :  { %s1784_s15 = sshll.u32 %s2655_s4, 4  ;;  %s1785_s15 = int_to_ptr.vmem [resolvable:$true] %s1784_s15 }
 0xeae   :  { %2564 = vrcp.f32 %v1429_v22  ;;  %s2619_s16 = scalar_lea.vmem %s1785_s15, 16  ;;  %s2623_s17 = scalar_lea.vmem %s1785_s15, 32 }
 0xeaf   :  { %p2620_p8 = scmp.ne.s32.totalorder %s1785_s15, %s2619_s16  ;;  %p2624_p9 = scmp.lt.s32.totalorder %s1785_s15, %s1785_s15 }
 0xeb0   :  { %p2625_p10 = scmp.lt.s32.totalorder %s2623_s17, %s2619_s16 }
 0xeb1   :  { %v2563_v25 = vpop.eup %2562 }
 0xeb2   :  { %v1388_v28 = vmul.f32 %v2563_v25, %v3020_v53  ;;  %v1625_v53 = vld [vmem:[#allocation2 + $0x7] ss:$8 sm:$0x3]  ;;  %p2626_p11 = por %p2625_p10, %p2624_p9 }
 0xeb4   :  { %p2627_p12 = pnand %p2626_p11, %p2620_p8 }
 0xeb8   :  { %v2565_v27 = vpop.eup %2564 }
 0xeb9   :  { %v1438_v36 = vmul.f32 %v2565_v27, %v3024_v59  ;;  %v1447_v45 = vrot.slane %v2565_v27, 1 }
 0xf11   :  { %v1434_v24 = vpop.permute.xlu0 %1433 }
 0xf12   :  { %v1435_v13 = vrot.slane %v1434_v24, 1 }
 0xf14   :  { %2566 = vtanh.f32 %v1435_v13 }
 0xf15   :  { %v1391_v26 = vpop.permute.xlu1 %1390 }
 0xf16   :  { %v1393_v15 = vmul.f32 %v2563_v25, %v1391_v26 }
 0xf18   :  { %1395 = vrot.lane.b32.xlu0 %v1393_v15, %s2654_s12 }
 0xf1e   :  { %v2567_v23 = vpop.eup %2566 }
 0xf1f   :  { %v1439_v20 = vmul.f32 %v2567_v23, %v2565_v27 }
 0xf21   :  { %1441 = vrot.lane.b32.xlu1 %v1439_v20, %s2649_s0 }
 0xf8a   :  { %v1396_v29 = vpop.permute.xlu0 %1395 }
 0xf8b   :  { %v3066_v31 = vadd.f32 %v1396_v29, %v1388_v28 }
 0xf8d   :  { %2568 = vtanh.f32 %v3066_v31 }
 0xf93   :  { %v1442_v37 = vpop.permute.xlu1 %1441 }
 0xf94   :  { %v3070_v38 = vadd.f32 %v1442_v37, %v1438_v36 }
 0xf96   :  { %2570 = vtanh.f32 %v3070_v38 }
 0xf97   :  { %v2569_v40 = vpop.eup %2568 }
 0xf98   :  { %1401 = vrot.lane.b32.xlu0 %v2569_v40, %s2654_s12 }
 0xfa0   :  { %v2571_v41 = vpop.eup %2570 }
 0xfa1   :  { %1450 = vrot.lane.b32.xlu1 %v2571_v41, %s2649_s0 }
0x100a   :  { %v1402_v42 = vpop.permute.xlu0 %1401 }
0x100b   :  { %v1404_v47 = vmul.f32 %v2563_v25, %v1402_v42 }
0x1013   :  { %v1451_v46 = vpop.permute.xlu1 %1450 }
0x1014   :  { %v1453_v49 = vmul.f32 %v1451_v46, %v1447_v45 }
0x1016   :  { %v1454_v50 = vsel %vm101_vm1, %v1453_v49, %v1404_v47 }
0x1017   :  { %1818 = vmatmul.mubr.msk.f32.vlgmr.msra.gmra.mrb[12].mxu0 %vm139_vm2, %v1454_v50  ;;  %2115 = vmatmul.mubr.msk.f32.vlgmr.msra.gmra.mrb[12].mxu1 %vm139_vm2, %v1454_v50 }
0x1018   :  { %2440 = vmatpush3.bf16.msra.mxu0 %v2721_v35  ;;  %2141 = vmatprep.mubr.msk.f32.mxu0 %vm2652_vm0, %v2651_v21 }
0x1019   :  { %2441 = vmatprep.subr.bf16.mxu0 %v2650_v30 }
0x101c   :  { %2443 = vmatpush3.bf16.msra.mxu0 %v2730_v44 }
0x101d   :  { %2444 = vmatprep.subr.bf16.mxu0 %v2650_v30 }
0x1020   :  { %2446 = vmatpush3.bf16.msra.mxu0 %v2740_v55 }
0x1021   :  { %2447 = vmatprep.subr.bf16.mxu0 %v2650_v30 }
0x1024   :  { %2449 = vmatpush3.bf16.msra.mxu0 %v2750_v0 }
0x1025   :  { %2450 = vmatprep.subr.bf16.mxu0 %v2650_v30 }
0x1028   :  { %2452 = vmatpush3.bf16.msra.mxu0 %v2760_v10 }
0x1029   :  { %2453 = vmatprep.subr.bf16.mxu0 %v2650_v30 }
0x102c   :  { %2455 = vmatpush3.bf16.msra.mxu0 %v2773_v19 }
0x10ea   :  { %v1524_v35 = vpop.f32.mrb[12].mxu0  ;;  %v1595_v21 = vpop.f32.mrb[12].mxu1 }
0x10eb   :  { %v1599_v44 = vadd.f32 %v1595_v21, %v2820_v32  ;;  %v1526_v3 = vpop.f32.mrb[13].mxu0  ;;  %v2116_v51 = vpop.f32.mrb[13].mxu1 }
0x10ec   :  { %v1628_v52 = vcombine.low %v1524_v35, %v1526_v3 }
0x10ed   :  { %2572 = vtanh.f32 %v1599_v44  ;;  %v1820_v30 = vmul.f32 -1.442695, %v1599_v44 }
0x10ee   :  { %v1635_v55 = vrot.slane %v1628_v52, %v2823_v33 }
0x10ef   :  { %2574 = vpow2.f32 %v1820_v30 }
0x10f0   :  { %v1642_v0 = vrot.slane %v1635_v55, %v2823_v33 }
0x10f2   :  { %v1644_v56 = vadd.f32 %v1642_v0, %v1625_v53 }
0x10f4   :  { %1652 = vrot.lane.b32.xlu0 %v1644_v56, %s2649_s0  ;;  %v1821_v19 = vmul.f32 -1.442695, %v1644_v56 }
0x10f6   :  { %2576 = vpow2.f32 %v1821_v19 }
0x10f7   :  { %v2573_v10 = vpop.eup %2572 }
0x10f8   :  { %1609 = vrot.lane.b32.xlu1 %v2573_v10, %s2654_s12 }
0x10f9   :  { %v2575_v32 = vpop.eup %2574 }
0x10fa   :  { %v1603_v58 = vadd.f32 1.0, %v2575_v32 }
0x10fc   :  { %2578 = vrcp.f32 %v1603_v58 }
0x1100   :  { %v2577_v59 = vpop.eup %2576 }
0x1101   :  { %v1648_v61 = vadd.f32 1.0, %v2577_v59 }
0x1103   :  { %2580 = vrcp.f32 %v1648_v61 }
0x1106   :  { %v2579_v33 = vpop.eup %2578 }
0x1107   :  { %v1607_v34 = vmul.f32 %v2579_v33, %v3066_v31 }
0x110d   :  { %v2581_v14 = vpop.eup %2580 }
0x110e   :  { %v1657_v48 = vmul.f32 %v2581_v14, %v3070_v38  ;;  %v1666_v11 = vrot.slane %v2581_v14, 1 }
0x1166   :  { %v1653_v62 = vpop.permute.xlu0 %1652 }
0x1167   :  { %v1654_v5 = vrot.slane %v1653_v62, 1 }
0x1169   :  { %2582 = vtanh.f32 %v1654_v5 }
0x116a   :  { %v1610_v60 = vpop.permute.xlu1 %1609 }
0x116b   :  { %v1612_v8 = vmul.f32 %v2579_v33, %v1610_v60 }
0x116d   :  { %1614 = vrot.lane.b32.xlu0 %v1612_v8, %s2654_s12 }
0x1173   :  { %v2583_v1 = vpop.eup %2582 }
0x1174   :  { %v1658_v17 = vmul.f32 %v2583_v1, %v2581_v14 }
0x1176   :  { %1660 = vrot.lane.b32.xlu1 %v1658_v17, %s2649_s0 }
0x11df   :  { %v1615_v39 = vpop.permute.xlu0 %1614 }
0x11e0   :  { %v1617_v43 = vadd.f32 %v1615_v39, %v1607_v34 }
0x11e2   :  { %2584 = vtanh.f32 %v1617_v43 }
0x11e8   :  { %v1661_v54 = vpop.permute.xlu1 %1660 }
0x11e9   :  { %v1663_v57 = vadd.f32 %v1661_v54, %v1657_v48 }
0x11eb   :  { %2586 = vtanh.f32 %v1663_v57 }
0x11ec   :  { %v2585_v63 = vpop.eup %2584 }
0x11ed   :  { %1620 = vrot.lane.b32.xlu0 %v2585_v63, %s2654_s12 }
0x11f5   :  { %v2587_v2 = vpop.eup %2586 }
0x11f6   :  { %1669 = vrot.lane.b32.xlu1 %v2587_v2, %s2649_s0 }
0x125f   :  { %v1621_v9 = vpop.permute.xlu0 %1620 }
0x1260   :  { %v1623_v4 = vmul.f32 %v2579_v33, %v1621_v9 }
0x1268   :  { %v1670_v16 = vpop.permute.xlu1 %1669 }
0x1269   :  { %v1672_v6 = vmul.f32 %v1670_v16, %v1666_v11 }
0x126b   :  { %v1673_v18 = vsel %vm101_vm1, %v1672_v6, %v1623_v4 }
0x126c   :  { %2142 = vmatmul.mubr.msk.f32.vlgmr.msra.gmra.mrb[14].mxu0 %vm139_vm2, %v1673_v18 }
0x133f   :  { %v1743_v12 = vpop.f32.mrb[14].mxu0 }
0x1340   :  { %v1747_v22 = vadd.f32 %v2596_v7, %v1743_v12  ;;  %v2143_v24 = vpop.f32.mrb[15].mxu0 }
0x1342   :  { %2588 = vtanh.f32 %v1747_v22  ;;  %v1823_v25 = vmul.f32 -1.442695, %v1747_v22 }
0x1344   :  { %2590 = vpow2.f32 %v1823_v25 }
0x134c   :  { %v2589_v13 = vpop.eup %2588 }
0x134d   :  { %1757 = vrot.lane.b32.xlu0 %v2589_v13, %s2654_s12 }
0x134e   :  { %v2591_v26 = vpop.eup %2590 }
0x134f   :  { %v1751_v15 = vadd.f32 1.0, %v2591_v26 }
0x1351   :  { %2592 = vrcp.f32 %v1751_v15 }
0x135b   :  { %v2593_v27 = vpop.eup %2592 }
0x135c   :  { %v1755_v28 = vmul.f32 %v2593_v27, %v1617_v43 }
0x13bf   :  { %v1758_v23 = vpop.permute.xlu0 %1757 }
0x13c0   :  { %v1760_v20 = vmul.f32 %v2593_v27, %v1758_v23 }
0x13c2   :  { %1762 = vrot.lane.b32.xlu1 %v1760_v20, %s2654_s12 }
0x1434   :  { %v1763_v29 = vpop.permute.xlu1 %1762 }
0x1435   :  { %v1765_v31 = vadd.f32 %v1763_v29, %v1755_v28 }
0x1437   :  { %2594 = vtanh.f32 %v1765_v31 }
0x1441   :  { %v2595_v36 = vpop.eup %2594 }
0x1442   :  { %1768 = vrot.lane.b32.xlu0 %v2595_v36, %s2654_s12 }
0x14b4   :  { %v1769_v37 = vpop.permute.xlu0 %1768 }
0x14b5   :  { %v1771_v38 = vmul.f32 %v2593_v27, %v1769_v37 }
0x14b7   :  { %1773 = vrot.lane.b32.xlu1 %v1771_v38, %s2649_s0 }
0x1529   :  { %v1774_v40 = vpop.permute.xlu1 %1773 }
0x152a   :  { %1777 = vst.msk [vmem:[#allocation6] sm:$0x1] %vm1776_vm3, %v1774_v40 }
0x152b   :  { %2630 = shalt.err (!%p2627_p12)
}
0x152c   :  { %s2631_s20 = scalar_lea.hbm %s3128_s5, 16 }
0x152d   :  { %p2632_p13 = scmp.ne.s32.totalorder %s3128_s5, %s2631_s20  ;;  %p2635_p0 = scmp.lt.u32.totalorder %s2631_s20, %s3128_s5 }
0x152f   :  { %p2637_p1 = pnand %p2635_p0, %p2632_p13 }
0x1531   :  { %2640 = shalt.err (!%p2637_p1)
}
0x1532   :  { %1787 = dma.vmem_to_hbm [thread:$0]  %s1785_s15, 16, %s3128_s5, [#allocation5]  }
0x1533   :  { %2643 = dma.done.wait [#allocation5], 16  }
0x1534   :  { %2644 = vsyncadd [#allocation5], 4294967280 }
0x1535   :  { %1791 = vsyncpa [#allocation4], 1 }
0x1536   :  { %1792 = vsyncpa [#allocation5], 1 }

</bundles_post_ra>
